<compile_context>
chip_gen: v7x
topology: tpu7x:2x2x1
jax: 0.10.0
libtpu: 0.0.40
codegen_flags: <defaults>
</compile_context>

<pallas_src>
import functools

import jax
import jax.numpy as jnp
from jax.experimental import pallas as pl
from jax.experimental.pallas import tpu as pltpu

_VMEM_LIMIT = 64 * 1024 * 1024  # valid cap on every generation (v7x physical = 64 MiB)


# ------------------------------ tile pickers -------------------------------

def _pick_row_tile(m):
    """Row (sublane) tile: prefer 256-multiples for the v6e/v7x 256-wide MXU;
    keep >= 2 grid blocks whenever m allows (megacore + pipeline overlap)."""
    for t in (512, 256, 128, 64, 32, 16, 8):
        if t < m and m % t == 0:
            return t
    return m


def _pick_lane_tile(n):
    """Lane tile: must be a multiple of 128 or the full extent."""
    for t in (512, 256, 128):
        if t < n and n % t == 0:
            return t
    return n


def _pick_seq_tile(batch, n):
    """Query-row tile for attention; only split N when batch alone cannot
    give both TensorCores a block."""
    if batch >= 2:
        return n
    for t in (1024, 512, 256, 128, 64, 32, 16, 8):
        if t < n and n % t == 0:
            return t
    return n


# ------------------------------ Pallas kernels ------------------------------

def _qkv_kernel(x_ref, w_ref, b_ref, q_ref, k_ref, v_ref):
    # x_ref: (tm, C) f32; w_ref: (3, C, tn) bf16; b_ref: (3, 1, tn) f32
    # q/k/v refs: (tm, tn) bf16 (separate outputs, no fused slab).
    x = x_ref[...].astype(jnp.bfloat16)
    for idx, out_ref in enumerate((q_ref, k_ref, v_ref)):
        acc = jnp.dot(x, w_ref[idx], preferred_element_type=jnp.float32)
        out_ref[...] = (acc + b_ref[idx]).astype(out_ref.dtype)   # bias add in f32


def _attention_kernel(q_ref, k_ref, v_ref, o_ref):
    # q_ref: (1, H, tq, hd) bf16 (already pre-scaled by 1/sqrt(hd) via Wq/bq)
    # k_ref/v_ref: (1, H, N, hd) bf16; o_ref: (1, tq, C) bf16, heads merged.
    q = q_ref[0]                                                   # (H, tq, hd)
    k = k_ref[0]                                                   # (H, N, hd)
    v = v_ref[0]                                                   # (H, N, hd)
    # scores = q @ k^T per head, batched over H, f32 accumulation on the MXU.
    s = jnp.einsum('hqd,hkd->hqk', q, k,
                   preferred_element_type=jnp.float32)             # (H, tq, N)
    # numerically-stable softmax in f32; normalization deferred past the PV
    # matmul so the VPU multiply is on the (tq, hd) result, not the (tq, N) tile.
    m = jnp.max(s, axis=-1, keepdims=True)
    p = jnp.exp(s - m)
    l = jnp.sum(p, axis=-1, keepdims=True)                         # (H, tq, 1)
    o = jnp.einsum('hqk,hkd->hqd', p.astype(jnp.bfloat16), v,
                   preferred_element_type=jnp.float32)             # (H, tq, hd)
    o = o * pl.reciprocal(l, approx=True)                          # EUP, ~free
    # merge heads along lanes -> (tq, C) in the final (B, N, H*hd) layout.
    merged = jnp.concatenate([o[h] for h in range(o.shape[0])], axis=-1)
    o_ref[0] = merged.astype(o_ref.dtype)


def _proj_kernel(x_ref, w_ref, b_ref, o_ref):
    # x_ref: (tm, C) bf16; w_ref: (C, tn) bf16; b_ref: (1, tn) f32; o_ref f32.
    acc = jnp.dot(x_ref[...], w_ref[...], preferred_element_type=jnp.float32)
    o_ref[...] = (acc + b_ref[...]).astype(o_ref.dtype)


# ------------------------------ Pallas wrappers -----------------------------

def qkv_linear(x2d, w_qkv, b_qkv):
    """x2d: (M, C) f32; w_qkv: (3, C, C) bf16; b_qkv: (3, 1, C) f32.
    Returns three (M, C) bf16 arrays: Q (pre-scaled), K, V."""
    M, C = x2d.shape
    tm = _pick_row_tile(M)
    tn = _pick_lane_tile(C)
    out_sds = jax.ShapeDtypeStruct((M, C), jnp.bfloat16)
    out_spec = pl.BlockSpec((tm, tn), lambda i, j: (i, j))
    return pl.pallas_call(
        _qkv_kernel,
        out_shape=(out_sds, out_sds, out_sds),
        grid=(M // tm, C // tn),
        in_specs=[
            pl.BlockSpec((tm, C), lambda i, j: (i, 0)),
            pl.BlockSpec((3, C, tn), lambda i, j: (0, 0, j)),   # weights resident per column tile
            pl.BlockSpec((3, 1, tn), lambda i, j: (0, 0, j)),
        ],
        out_specs=(out_spec, out_spec, out_spec),
        compiler_params=pltpu.CompilerParams(
            dimension_semantics=("parallel", "parallel"),
            vmem_limit_bytes=_VMEM_LIMIT),
    )(x2d, w_qkv, b_qkv)


def attention(q, k, v):
    """q, k, v: (B, H, N, hd) bf16 (q pre-scaled).
    Returns (B, N, H*hd) bf16 with heads already merged/transposed."""
    B, H, N, hd = q.shape
    C = H * hd
    tq = _pick_seq_tile(B, N)
    # TODO(synk): for very long sequences (full (H,N,N) f32 scores near VMEM,
    # ~N>2K on v7x), switch to a flash-style KV-tiled grid with online softmax.
    q_spec = pl.BlockSpec((1, H, tq, hd), lambda b, i: (b, 0, i, 0))
    kv_spec = pl.BlockSpec((1, H, N, hd), lambda b, i: (b, 0, 0, 0))
    o_spec = pl.BlockSpec((1, tq, C), lambda b, i: (b, i, 0))
    return pl.pallas_call(
        _attention_kernel,
        out_shape=jax.ShapeDtypeStruct((B, N, C), jnp.bfloat16),
        grid=(B, N // tq),
        in_specs=[q_spec, kv_spec, kv_spec],
        out_specs=o_spec,
        compiler_params=pltpu.CompilerParams(
            dimension_semantics=("parallel", "parallel"),
            vmem_limit_bytes=_VMEM_LIMIT),
    )(q, k, v)


def proj_linear(x2d, w, b):
    """x2d: (M, C) bf16; w: (C, C) bf16; b: (1, C) f32. Returns (M, C) f32."""
    M, C = x2d.shape
    Nout = w.shape[1]
    tm = _pick_row_tile(M)
    tn = _pick_lane_tile(Nout)
    return pl.pallas_call(
        _proj_kernel,
        out_shape=jax.ShapeDtypeStruct((M, Nout), jnp.float32),
        grid=(M // tm, Nout // tn),
        in_specs=[
            pl.BlockSpec((tm, C), lambda i, j: (i, 0)),
            pl.BlockSpec((C, tn), lambda i, j: (0, j)),
            pl.BlockSpec((1, tn), lambda i, j: (0, j)),
        ],
        out_specs=pl.BlockSpec((tm, tn), lambda i, j: (i, j)),
        compiler_params=pltpu.CompilerParams(
            dimension_semantics=("parallel", "parallel"),
            vmem_limit_bytes=_VMEM_LIMIT),
    )(x2d, w, b)


# --------------------------- parameter preparation --------------------------

def prepare_params(wq, bq, wk, bk, wv, bv, wp, bp, num_heads):
    """One-time prep OUTSIDE the jitted forward: transpose torch-layout
    weights, stack QKV, fold 1/scale into Wq/bq, pre-cast weights to bf16."""
    C = wq.shape[0]
    hd = C // num_heads
    inv_scale = 1.0 / (hd ** 0.5)
    w_qkv = jnp.stack([wq.T * inv_scale, wk.T, wv.T], axis=0).astype(jnp.bfloat16)
    b_qkv = jnp.stack([bq * inv_scale, bk, bv], axis=0).reshape(3, 1, C)
    b_qkv = b_qkv.astype(jnp.float32)
    w_proj = wp.T.astype(jnp.bfloat16)
    b_proj = bp.reshape(1, C).astype(jnp.float32)
    return w_qkv, b_qkv, w_proj, b_proj


# --------------------------------- forward ----------------------------------

def mha_forward(x, w_qkv, b_qkv, w_proj, b_proj, *, num_heads):
    """x: (B, N, C) f32; prepared params from prepare_params().
    Returns (B, N, C) f32, matching MultiHeadAttention.forward."""
    B, N, C = x.shape
    hd = C // num_heads
    M = B * N

    # Fused QKV projection: three separate bf16 outputs, no sliced slab.
    q2, k2, v2 = qkv_linear(x.reshape(M, C).astype(jnp.float32), w_qkv, b_qkv)

    # Head split: the spec's DIRECT reshape (B, N, C) -> (B, H, N, hd).
    # These are contiguous reinterpretations (truly zero-copy).
    q = q2.reshape(B, num_heads, N, hd)
    k = k2.reshape(B, num_heads, N, hd)
    v = v2.reshape(B, num_heads, N, hd)

    # Fused scale(pre-folded) + softmax + PV; output already in merged
    # (B, N, H*hd) layout — no transpose, lane-dense writeback.
    o = attention(q, k, v)                                   # (B, N, C) bf16

    out = proj_linear(o.reshape(M, C), w_proj, b_proj)       # (M, C) f32
    return out.reshape(B, N, C)


# ----------------------------- pure-JAX reference ---------------------------

def mha_reference(x, wq, bq, wk, bk, wv, bv, wp, bp, num_heads):
    B, N, C = x.shape
    hd = C // num_heads
    scale = hd ** 0.5
    q = (x @ wq.T + bq).reshape(B, num_heads, N, hd)
    k = (x @ wk.T + bk).reshape(B, num_heads, N, hd)
    v = (x @ wv.T + bv).reshape(B, num_heads, N, hd)
    attn = jnp.einsum('bhnd,bhmd->bhnm', q, k) / scale
    attn = jax.nn.softmax(attn, axis=-1)
    o = jnp.einsum('bhnm,bhmd->bhnd', attn, v)
    o = jnp.transpose(o, (0, 2, 1, 3)).reshape(B, N, C)
    return o @ wp.T + bp


# ----------------------------------- main ------------------------------------

if __name__ == "__main__":
    key = jax.random.PRNGKey(0)
    keys = jax.random.split(key, 9)

    # Small shapes consistent with the module: dim divisible by num_heads.
    B, N, C, H = 2, 8, 32, 8
    x = jax.random.normal(keys[0], (B, N, C), dtype=jnp.float32)

    # nn.Linear-style init: U(-1/sqrt(in), 1/sqrt(in)), torch weight layout.
    bound = 1.0 / (C ** 0.5)

    def u(k, shape):
        return jax.random.uniform(k, shape, jnp.float32, -bound, bound)

    wq, wk, wv, wp = (u(keys[1], (C, C)), u(keys[2], (C, C)),
                      u(keys[3], (C, C)), u(keys[4], (C, C)))
    bq, bk, bv, bp = (u(keys[5], (C,)), u(keys[6], (C,)),
                      u(keys[7], (C,)), u(keys[8], (C,)))

    # One-time parameter prep (transpose/stack/scale-fold/bf16) outside jit.
    params = prepare_params(wq, bq, wk, bk, wv, bv, wp, bp, H)

    fwd = jax.jit(functools.partial(mha_forward, num_heads=H))
    out = fwd(x, *params)
    out = jax.block_until_ready(out)

    ref = mha_reference(x, wq, bq, wk, bk, wv, bv, wp, bp, H)

    assert out.shape == (B, N, C), out.shape
    assert out.dtype == jnp.float32
    # bf16 intermediates / MXU operands (f32 accumulation) -> loose tolerance.
    max_err = float(jnp.max(jnp.abs(out - ref)))
    assert jnp.allclose(out, ref, atol=5e-2, rtol=5e-2), max_err
    print("KERNEL_OK")
</pallas_src>

<mosaic_0001>
module attributes {stable_mosaic.version = 11 : i64} {
  func.func @_proj_kernel(%arg0: i32, %arg1: i32, %arg2: memref<8x32xbf16, #tpu.memory_space<vmem>>, %arg3: memref<32x32xbf16, #tpu.memory_space<vmem>>, %arg4: memref<1x32xf32, #tpu.memory_space<vmem>>, %arg5: memref<8x32xf32, #tpu.memory_space<vmem>>) attributes {dimension_semantics = [#tpu.dimension_semantics<parallel>, #tpu.dimension_semantics<parallel>], iteration_bounds = array<i64: 2, 1>, scalar_prefetch = 0 : i64, scratch_operands = 0 : i64, tpu.core_type = #tpu.core_type<tc>, window_params = [{transform_indices = @transform_0, window_bounds = array<i64: 8, 32>}, {transform_indices = @transform_1, window_bounds = array<i64: 32, 32>}, {transform_indices = @transform_2, window_bounds = array<i64: 1, 32>}, {transform_indices = @transform_3, window_bounds = array<i64: 8, 32>}]} {
    %c0 = arith.constant 0 : index
    %c0_0 = arith.constant 0 : index
    %0 = vector.load %arg2[%c0, %c0_0] : memref<8x32xbf16, #tpu.memory_space<vmem>>, vector<8x32xbf16>
    %c0_1 = arith.constant 0 : index
    %c0_2 = arith.constant 0 : index
    %1 = vector.load %arg3[%c0_1, %c0_2] : memref<32x32xbf16, #tpu.memory_space<vmem>>, vector<32x32xbf16>
    %cst = arith.constant dense<0.000000e+00> : vector<8x32xf32>
    %2 = tpu.matmul %0, %1, %cst {dimension_numbers = #tpu.dot_dimension_numbers<[1], [0], [0], [1], [0, 0, 1, 1], [], []>} : vector<8x32xbf16>, vector<32x32xbf16>, vector<8x32xf32> -> vector<8x32xf32>
    %c0_3 = arith.constant 0 : index
    %c0_4 = arith.constant 0 : index
    %3 = vector.load %arg4[%c0_3, %c0_4] : memref<1x32xf32, #tpu.memory_space<vmem>>, vector<1x32xf32>
    %4 = vector.broadcast %3 : vector<1x32xf32> to vector<8x32xf32>
    %5 = arith.addf %2, %4 : vector<8x32xf32>
    %c0_5 = arith.constant 0 : index
    %c0_6 = arith.constant 0 : index
    %6 = vector.load %arg5[%c0_5, %c0_6] : memref<8x32xf32, #tpu.memory_space<vmem>>, vector<8x32xf32>
    tpu.vector_store %arg5[%c0_5, %c0_6], %5 {strides = array<i32>} : memref<8x32xf32, #tpu.memory_space<vmem>>, vector<8x32xf32>,
    return
  }
  func.func @transform_0(%arg0: i32, %arg1: i32) -> (i32, i32) {
    %c0_i32 = arith.constant 0 : i32
    %c0_i32_0 = arith.constant 0 : i32
    return %arg0, %c0_i32 : i32, i32
  }
  func.func @transform_1(%arg0: i32, %arg1: i32) -> (i32, i32) {
    %c0_i32 = arith.constant 0 : i32
    %c0_i32_0 = arith.constant 0 : i32
    return %c0_i32, %arg1 : i32, i32
  }
  func.func @transform_2(%arg0: i32, %arg1: i32) -> (i32, i32) {
    %c0_i32 = arith.constant 0 : i32
    %c0_i32_0 = arith.constant 0 : i32
    return %c0_i32, %arg1 : i32, i32
  }
  func.func @transform_3(%arg0: i32, %arg1: i32) -> (i32, i32) {
    %c0_i32 = arith.constant 0 : i32
    return %arg0, %arg1 : i32, i32
  }
}

module attributes {stable_mosaic.version = 11 : i64} {
  func.func @_qkv_kernel(%arg0: i32, %arg1: i32, %arg2: memref<8x32xf32, #tpu.memory_space<vmem>>, %arg3: memref<3x32x32xbf16, #tpu.memory_space<vmem>>, %arg4: memref<3x1x32xf32, #tpu.memory_space<vmem>>, %arg5: memref<8x32xbf16, #tpu.memory_space<vmem>>, %arg6: memref<8x32xbf16, #tpu.memory_space<vmem>>, %arg7: memref<8x32xbf16, #tpu.memory_space<vmem>>) attributes {dimension_semantics = [#tpu.dimension_semantics<parallel>, #tpu.dimension_semantics<parallel>], iteration_bounds = array<i64: 2, 1>, scalar_prefetch = 0 : i64, scratch_operands = 0 : i64, tpu.core_type = #tpu.core_type<tc>, window_params = [{transform_indices = @transform_0, window_bounds = array<i64: 8, 32>}, {transform_indices = @transform_1, window_bounds = array<i64: 3, 32, 32>}, {transform_indices = @transform_2, window_bounds = array<i64: 3, 1, 32>}, {transform_indices = @transform_3, window_bounds = array<i64: 8, 32>}, {transform_indices = @transform_4, window_bounds = array<i64: 8, 32>}, {transform_indices = @transform_5, window_bounds = array<i64: 8, 32>}]} {
    %c0 = arith.constant 0 : index
    %c0_0 = arith.constant 0 : index
    %0 = vector.load %arg2[%c0, %c0_0] : memref<8x32xf32, #tpu.memory_space<vmem>>, vector<8x32xf32>
    %1 = arith.truncf %0 : vector<8x32xf32> to vector<8x32xbf16>
    %c0_1 = arith.constant 0 : index
    %c0_2 = arith.constant 0 : index
    %c0_3 = arith.constant 0 : index
    %2 = vector.load %arg3[%c0_1, %c0_2, %c0_3] : memref<3x32x32xbf16, #tpu.memory_space<vmem>>, vector<1x32x32xbf16>
    %3 = vector.shape_cast %2 : vector<1x32x32xbf16> to vector<32x32xbf16>
    %cst = arith.constant dense<0.000000e+00> : vector<8x32xf32>
    %4 = tpu.matmul %1, %3, %cst {dimension_numbers = #tpu.dot_dimension_numbers<[1], [0], [0], [1], [0, 0, 1, 1], [], []>} : vector<8x32xbf16>, vector<32x32xbf16>, vector<8x32xf32> -> vector<8x32xf32>
    %c0_4 = arith.constant 0 : index
    %c0_5 = arith.constant 0 : index
    %c0_6 = arith.constant 0 : index
    %5 = vector.load %arg4[%c0_4, %c0_5, %c0_6] : memref<3x1x32xf32, #tpu.memory_space<vmem>>, vector<1x1x32xf32>
    %6 = vector.shape_cast %5 : vector<1x1x32xf32> to vector<1x32xf32>
    %7 = vector.broadcast %6 : vector<1x32xf32> to vector<8x32xf32>
    %8 = arith.addf %4, %7 : vector<8x32xf32>
    %9 = arith.truncf %8 : vector<8x32xf32> to vector<8x32xbf16>
    %c0_7 = arith.constant 0 : index
    %c0_8 = arith.constant 0 : index
    %10 = vector.load %arg5[%c0_7, %c0_8] : memref<8x32xbf16, #tpu.memory_space<vmem>>, vector<8x32xbf16>
    tpu.vector_store %arg5[%c0_7, %c0_8], %9 {strides = array<i32>} : memref<8x32xbf16, #tpu.memory_space<vmem>>, vector<8x32xbf16>,
    %c1 = arith.constant 1 : index
    %c0_9 = arith.constant 0 : index
    %c0_10 = arith.constant 0 : index
    %11 = vector.load %arg3[%c1, %c0_9, %c0_10] : memref<3x32x32xbf16, #tpu.memory_space<vmem>>, vector<1x32x32xbf16>
    %12 = vector.shape_cast %11 : vector<1x32x32xbf16> to vector<32x32xbf16>
    %cst_11 = arith.constant dense<0.000000e+00> : vector<8x32xf32>
    %13 = tpu.matmul %1, %12, %cst_11 {dimension_numbers = #tpu.dot_dimension_numbers<[1], [0], [0], [1], [0, 0, 1, 1], [], []>} : vector<8x32xbf16>, vector<32x32xbf16>, vector<8x32xf32> -> vector<8x32xf32>
    %c1_12 = arith.constant 1 : index
    %c0_13 = arith.constant 0 : index
    %c0_14 = arith.constant 0 : index
    %14 = vector.load %arg4[%c1_12, %c0_13, %c0_14] : memref<3x1x32xf32, #tpu.memory_space<vmem>>, vector<1x1x32xf32>
    %15 = vector.shape_cast %14 : vector<1x1x32xf32> to vector<1x32xf32>
    %16 = vector.broadcast %15 : vector<1x32xf32> to vector<8x32xf32>
    %17 = arith.addf %13, %16 : vector<8x32xf32>
    %18 = arith.truncf %17 : vector<8x32xf32> to vector<8x32xbf16>
    %c0_15 = arith.constant 0 : index
    %c0_16 = arith.constant 0 : index
    %19 = vector.load %arg6[%c0_15, %c0_16] : memref<8x32xbf16, #tpu.memory_space<vmem>>, vector<8x32xbf16>
    tpu.vector_store %arg6[%c0_15, %c0_16], %18 {strides = array<i32>} : memref<8x32xbf16, #tpu.memory_space<vmem>>, vector<8x32xbf16>,
    %c2 = arith.constant 2 : index
    %c0_17 = arith.constant 0 : index
    %c0_18 = arith.constant 0 : index
    %20 = vector.load %arg3[%c2, %c0_17, %c0_18] : memref<3x32x32xbf16, #tpu.memory_space<vmem>>, vector<1x32x32xbf16>
    %21 = vector.shape_cast %20 : vector<1x32x32xbf16> to vector<32x32xbf16>
    %cst_19 = arith.constant dense<0.000000e+00> : vector<8x32xf32>
    %22 = tpu.matmul %1, %21, %cst_19 {dimension_numbers = #tpu.dot_dimension_numbers<[1], [0], [0], [1], [0, 0, 1, 1], [], []>} : vector<8x32xbf16>, vector<32x32xbf16>, vector<8x32xf32> -> vector<8x32xf32>
    %c2_20 = arith.constant 2 : index
    %c0_21 = arith.constant 0 : index
    %c0_22 = arith.constant 0 : index
    %23 = vector.load %arg4[%c2_20, %c0_21, %c0_22] : memref<3x1x32xf32, #tpu.memory_space<vmem>>, vector<1x1x32xf32>
    %24 = vector.shape_cast %23 : vector<1x1x32xf32> to vector<1x32xf32>
    %25 = vector.broadcast %24 : vector<1x32xf32> to vector<8x32xf32>
    %26 = arith.addf %22, %25 : vector<8x32xf32>
    %27 = arith.truncf %26 : vector<8x32xf32> to vector<8x32xbf16>
    %c0_23 = arith.constant 0 : index
    %c0_24 = arith.constant 0 : index
    %28 = vector.load %arg7[%c0_23, %c0_24] : memref<8x32xbf16, #tpu.memory_space<vmem>>, vector<8x32xbf16>
    tpu.vector_store %arg7[%c0_23, %c0_24], %27 {strides = array<i32>} : memref<8x32xbf16, #tpu.memory_space<vmem>>, vector<8x32xbf16>,
    return
  }
  func.func @transform_0(%arg0: i32, %arg1: i32) -> (i32, i32) {
    %c0_i32 = arith.constant 0 : i32
    %c0_i32_0 = arith.constant 0 : i32
    return %arg0, %c0_i32 : i32, i32
  }
  func.func @transform_1(%arg0: i32, %arg1: i32) -> (i32, i32, i32) {
    %c0_i32 = arith.constant 0 : i32
    %c0_i32_0 = arith.constant 0 : i32
    %c0_i32_1 = arith.constant 0 : i32
    return %c0_i32, %c0_i32_0, %arg1 : i32, i32, i32
  }
  func.func @transform_2(%arg0: i32, %arg1: i32) -> (i32, i32, i32) {
    %c0_i32 = arith.constant 0 : i32
    %c0_i32_0 = arith.constant 0 : i32
    %c0_i32_1 = arith.constant 0 : i32
    return %c0_i32, %c0_i32_0, %arg1 : i32, i32, i32
  }
  func.func @transform_3(%arg0: i32, %arg1: i32) -> (i32, i32) {
    %c0_i32 = arith.constant 0 : i32
    return %arg0, %arg1 : i32, i32
  }
  func.func @transform_4(%arg0: i32, %arg1: i32) -> (i32, i32) {
    %c0_i32 = arith.constant 0 : i32
    return %arg0, %arg1 : i32, i32
  }
  func.func @transform_5(%arg0: i32, %arg1: i32) -> (i32, i32) {
    %c0_i32 = arith.constant 0 : i32
    return %arg0, %arg1 : i32, i32
  }
}

module attributes {stable_mosaic.version = 11 : i64} {
  func.func @_attention_kernel(%arg0: i32, %arg1: i32, %arg2: memref<1x8x8x4xbf16, #tpu.memory_space<vmem>>, %arg3: memref<1x8x8x4xbf16, #tpu.memory_space<vmem>>, %arg4: memref<1x8x8x4xbf16, #tpu.memory_space<vmem>>, %arg5: memref<1x8x32xbf16, #tpu.memory_space<vmem>>) attributes {dimension_semantics = [#tpu.dimension_semantics<parallel>, #tpu.dimension_semantics<parallel>], iteration_bounds = array<i64: 2, 1>, scalar_prefetch = 0 : i64, scratch_operands = 0 : i64, tpu.core_type = #tpu.core_type<tc>, window_params = [{transform_indices = @transform_0, window_bounds = array<i64: 1, 8, 8, 4>}, {transform_indices = @transform_1, window_bounds = array<i64: 1, 8, 8, 4>}, {transform_indices = @transform_2, window_bounds = array<i64: 1, 8, 8, 4>}, {transform_indices = @transform_3, window_bounds = array<i64: 1, 8, 32>}]} {
    %c0 = arith.constant 0 : index
    %c0_0 = arith.constant 0 : index
    %c0_1 = arith.constant 0 : index
    %c0_2 = arith.constant 0 : index
    %0 = vector.load %arg2[%c0, %c0_0, %c0_1, %c0_2] : memref<1x8x8x4xbf16, #tpu.memory_space<vmem>>, vector<1x8x8x4xbf16>
    %1 = vector.shape_cast %0 : vector<1x8x8x4xbf16> to vector<8x8x4xbf16>
    %c0_3 = arith.constant 0 : index
    %c0_4 = arith.constant 0 : index
    %c0_5 = arith.constant 0 : index
    %c0_6 = arith.constant 0 : index
    %2 = vector.load %arg3[%c0_3, %c0_4, %c0_5, %c0_6] : memref<1x8x8x4xbf16, #tpu.memory_space<vmem>>, vector<1x8x8x4xbf16>
    %3 = vector.shape_cast %2 : vector<1x8x8x4xbf16> to vector<8x8x4xbf16>
    %c0_7 = arith.constant 0 : index
    %c0_8 = arith.constant 0 : index
    %c0_9 = arith.constant 0 : index
    %c0_10 = arith.constant 0 : index
    %4 = vector.load %arg4[%c0_7, %c0_8, %c0_9, %c0_10] : memref<1x8x8x4xbf16, #tpu.memory_space<vmem>>, vector<1x8x8x4xbf16>
    %5 = vector.shape_cast %4 : vector<1x8x8x4xbf16> to vector<8x8x4xbf16>
    "tpu.trace_start"() <{level = 10 : i32, message = "hqd,hkd->hqk"}> : () -> ()
    %cst = arith.constant dense<0.000000e+00> : vector<8x8x8xf32>
    %6 = tpu.matmul %1, %3, %cst {dimension_numbers = #tpu.dot_dimension_numbers<[2], [2], [1], [1], [0, 0, 0, 1, 1, 1], [0], [0]>} : vector<8x8x4xbf16>, vector<8x8x4xbf16>, vector<8x8x8xf32> -> vector<8x8x8xf32>
    "tpu.trace_stop"() : () -> ()
    %cst_11 = arith.constant dense<0xFF800000> : vector<8x8xf32>
    %7 = vector.multi_reduction <maximumf>, %6, %cst_11 [2] : vector<8x8x8xf32> to vector<8x8xf32>
    %8 = vector.shape_cast %7 : vector<8x8xf32> to vector<8x8x1xf32>
    %9 = vector.broadcast %8 : vector<8x8x1xf32> to vector<8x8x8xf32>
    %10 = arith.subf %6, %9 : vector<8x8x8xf32>
    %11 = math.exp %10 : vector<8x8x8xf32>
    %cst_12 = arith.constant dense<0.000000e+00> : vector<8x8xf32>
    %12 = vector.multi_reduction <add>, %11, %cst_12 [2] : vector<8x8x8xf32> to vector<8x8xf32>
    %13 = vector.shape_cast %12 : vector<8x8xf32> to vector<8x8x1xf32>
    %14 = arith.truncf %11 : vector<8x8x8xf32> to vector<8x8x8xbf16>
    "tpu.trace_start"() <{level = 10 : i32, message = "hqk,hkd->hqd"}> : () -> ()
    %cst_13 = arith.constant dense<0.000000e+00> : vector<8x8x4xf32>
    %15 = tpu.matmul %14, %5, %cst_13 {dimension_numbers = #tpu.dot_dimension_numbers<[2], [1], [1], [2], [0, 0, 0, 1, 1, 2], [0], [0]>} : vector<8x8x8xbf16>, vector<8x8x4xbf16>, vector<8x8x4xf32> -> vector<8x8x4xf32>
    "tpu.trace_stop"() : () -> ()
    %16 = tpu.reciprocal %13 {approx = true} : vector<8x8x1xf32> -> vector<8x8x1xf32>
    %17 = vector.broadcast %16 : vector<8x8x1xf32> to vector<8x8x4xf32>
    %18 = arith.mulf %15, %17 : vector<8x8x4xf32>
    %19 = vector.extract_strided_slice %18 {offsets = [0, 0, 0], sizes = [1, 8, 4], strides = [1, 1, 1]} : vector<8x8x4xf32> to vector<1x8x4xf32>
    %20 = vector.shape_cast %19 : vector<1x8x4xf32> to vector<8x4xf32>
    %21 = vector.extract_strided_slice %18 {offsets = [1, 0, 0], sizes = [1, 8, 4], strides = [1, 1, 1]} : vector<8x8x4xf32> to vector<1x8x4xf32>
    %22 = vector.shape_cast %21 : vector<1x8x4xf32> to vector<8x4xf32>
    %23 = vector.extract_strided_slice %18 {offsets = [2, 0, 0], sizes = [1, 8, 4], strides = [1, 1, 1]} : vector<8x8x4xf32> to vector<1x8x4xf32>
    %24 = vector.shape_cast %23 : vector<1x8x4xf32> to vector<8x4xf32>
    %25 = vector.extract_strided_slice %18 {offsets = [3, 0, 0], sizes = [1, 8, 4], strides = [1, 1, 1]} : vector<8x8x4xf32> to vector<1x8x4xf32>
    %26 = vector.shape_cast %25 : vector<1x8x4xf32> to vector<8x4xf32>
    %27 = vector.extract_strided_slice %18 {offsets = [4, 0, 0], sizes = [1, 8, 4], strides = [1, 1, 1]} : vector<8x8x4xf32> to vector<1x8x4xf32>
    %28 = vector.shape_cast %27 : vector<1x8x4xf32> to vector<8x4xf32>
    %29 = vector.extract_strided_slice %18 {offsets = [5, 0, 0], sizes = [1, 8, 4], strides = [1, 1, 1]} : vector<8x8x4xf32> to vector<1x8x4xf32>
    %30 = vector.shape_cast %29 : vector<1x8x4xf32> to vector<8x4xf32>
    %31 = vector.extract_strided_slice %18 {offsets = [6, 0, 0], sizes = [1, 8, 4], strides = [1, 1, 1]} : vector<8x8x4xf32> to vector<1x8x4xf32>
    %32 = vector.shape_cast %31 : vector<1x8x4xf32> to vector<8x4xf32>
    %33 = vector.extract_strided_slice %18 {offsets = [7, 0, 0], sizes = [1, 8, 4], strides = [1, 1, 1]} : vector<8x8x4xf32> to vector<1x8x4xf32>
    %34 = vector.shape_cast %33 : vector<1x8x4xf32> to vector<8x4xf32>
    %35 = tpu.concatenate %20, %22, %24, %26, %28, %30, %32, %34 in 1 : vector<8x4xf32>, vector<8x4xf32>, vector<8x4xf32>, vector<8x4xf32>, vector<8x4xf32>, vector<8x4xf32>, vector<8x4xf32>, vector<8x4xf32> -> vector<8x32xf32>
    %36 = arith.truncf %35 : vector<8x32xf32> to vector<8x32xbf16>
    %c0_14 = arith.constant 0 : index
    %c0_15 = arith.constant 0 : index
    %c0_16 = arith.constant 0 : index
    %37 = vector.load %arg5[%c0_14, %c0_15, %c0_16] : memref<1x8x32xbf16, #tpu.memory_space<vmem>>, vector<1x8x32xbf16>
    %38 = vector.shape_cast %37 : vector<1x8x32xbf16> to vector<8x32xbf16>
    %39 = vector.shape_cast %36 : vector<8x32xbf16> to vector<1x8x32xbf16>
    tpu.vector_store %arg5[%c0_14, %c0_15, %c0_16], %39 {strides = array<i32>} : memref<1x8x32xbf16, #tpu.memory_space<vmem>>, vector<1x8x32xbf16>,
    return
  }
  func.func @transform_0(%arg0: i32, %arg1: i32) -> (i32, i32, i32, i32) {
    %c0_i32 = arith.constant 0 : i32
    %c0_i32_0 = arith.constant 0 : i32
    %c0_i32_1 = arith.constant 0 : i32
    return %arg0, %c0_i32, %arg1, %c0_i32_0 : i32, i32, i32, i32
  }
  func.func @transform_1(%arg0: i32, %arg1: i32) -> (i32, i32, i32, i32) {
    %c0_i32 = arith.constant 0 : i32
    %c0_i32_0 = arith.constant 0 : i32
    %c0_i32_1 = arith.constant 0 : i32
    %c0_i32_2 = arith.constant 0 : i32
    return %arg0, %c0_i32, %c0_i32_0, %c0_i32_1 : i32, i32, i32, i32
  }
  func.func @transform_2(%arg0: i32, %arg1: i32) -> (i32, i32, i32, i32) {
    %c0_i32 = arith.constant 0 : i32
    %c0_i32_0 = arith.constant 0 : i32
    %c0_i32_1 = arith.constant 0 : i32
    %c0_i32_2 = arith.constant 0 : i32
    return %arg0, %c0_i32, %c0_i32_0, %c0_i32_1 : i32, i32, i32, i32
  }
  func.func @transform_3(%arg0: i32, %arg1: i32) -> (i32, i32, i32) {
    %c0_i32 = arith.constant 0 : i32
    %c0_i32_0 = arith.constant 0 : i32
    return %arg0, %arg1, %c0_i32 : i32, i32, i32
  }
}

</mosaic_0001>

<bundles_post_ra>
// kernel: mha_forward.5
= control target key start
LH: loop header
LB: loop body
LE: loop exit
PB: predicated region body
PF: predicated region fallthrough
CT: control target
= control target key end

     0   :  { %8 = vsyncpa [#allocation3], 0  ;;  %s1003_s0 = inlined_call_operand.hbm [shape: bf16[16,32], index: 0, kind: input, shape index: {}]   ;;  %s1004_s1 = inlined_call_operand.hbm [shape: bf16[32,32], index: 1, kind: input, shape index: {}]   ;;  %s1005_s2 = inlined_call_operand.hbm [shape: f32[1,32], index: 2, kind: input, shape index: {}]   ;;  %s1006_s3 = inlined_call_operand.hbm [shape: f32[16,32], index: 3, kind: output, shape index: {}]  }
   0x1   :  { %10 = vsyncpa [#allocation3 + $0x1], 0 }
   0x2   :  { %11 = vsyncpa [#allocation6], 0 }
   0x3   :  { %12 = vsyncpa [#allocation4], 0 }
   0x4   :  { %14 = vsyncpa [#allocation4 + $0x1], 0  ;;  %s751_s12 = smov 0   ;;  %s753_s13 = smov 0  }
   0x5   :  { %s755_s14 = smov 0   ;;  %s757_s15 = smov 0  }
   0x6   :  { %s759_s16 = smov 0   ;;  %s761_s17 = smov 0  }
   0x7 LB: > { %s428_s18 = sadd.s32 4294967295, %s721_s17   ;;  %s429_s19 = sadd.s32 4294967294, %s721_s17   ;;  %s721_s17 = sphi %s761_s17, %s20_s17   ;;  %s717_s16 = sphi %s759_s16, %s1028_s16   ;;  %s713_s15 = sphi %s757_s15, %s1027_s15   ;;  %s709_s14 = sphi %s755_s14, %s1026_s14   ;;  %s705_s13 = sphi %s753_s13, %s1025_s13   ;;  %s701_s12 = sphi %s751_s12, %s1024_s12  }
   0x8   : > { %p52_p0 = scmp.ne.s32.totalorder %s705_s13, %s701_s12  ;;  %p785_p1 = scmp.eq.s32.totalorder %s428_s18, 0 }
   0x9   : > { %p789_p2 = scmp.eq.s32.totalorder %s428_s18, 1  ;;  %p136_p3 = scmp.eq.s32.totalorder %s429_s19, 1 }
   0xa   : > { %s1011_s20 = scalar_select %p785_p1, 1, 0 }
   0xb   : > { %p795_p4 = por %p785_p1, %p52_p0  ;;  %p430_p5 = scmp.ge.s32.totalorder %s721_s17, 1 }
   0xc   : > { %p800_p6 = por %p136_p3, %p52_p0  ;;  %p143_p7 = scmp.lt.s32.totalorder %s721_s17, 3 }
   0xd   : > { %s1013_s22 = scalar_select %p795_p4, 1, 0 }
   0xe   : > { %s1014_s23 = scalar_select %p800_p6, 1, 0 }
   0xf   : > { %p805_p8 = pnand %p430_p5, %p143_p7  ;;  %s723_s25 = smov [#allocation5]  }
  0x10   : > { %s157_s26 = sshll.u32 %s723_s25, 4  ;;  %s724_s28 = smov [#allocation7]   ;;  %s809_s26 = int_to_ptr.vmem [resolvable:$true] %s157_s26 }
  0x11   : > { %p472_p9 = pneg %p805_p8  ;;  %s173_s29 = sshll.u32 %s724_s28, 4  ;;  %s820_s29 = int_to_ptr.vmem [resolvable:$true] %s173_s29 }
  0x12   : > { %s549_s5 = scalar_lea.hbm %s1004_s1, 256 }
  0x13   : > { %p816_p11 = pnand %p472_p9, %p785_p1  ;;  %p550_p12 = scmp.ne.s32.totalorder %s1004_s1, %s549_s5 }
  0x14   : > { %p556_p5 = scmp.lt.u32.totalorder %s549_s5, %s1004_s1 }
  0x15   : > { %p551_p13 = pneg %p816_p11 }
  0x17   : > { %p552_p0 = pnand %p551_p13, %p550_p12 }
  0x19   : > { %p553_p3 = pneg %p552_p0 }
  0x1b   : > { %p558_p7 = pnand %p556_p5, %p553_p3 }
  0x1d   : > { %561 = shalt.err (!%p558_p7)
}
  0x1e   : > { %s562_s10 = scalar_lea.vmem %s809_s26, 256  ;;  %p570_p1 = scmp.lt.s32.totalorder %s809_s26, %s809_s26 }
  0x1f   : > { %p563_p9 = scmp.ne.s32.totalorder %s809_s26, %s562_s10  ;;  %p571_p12 = scmp.lt.s32.totalorder %s562_s10, %s562_s10 }
  0x21   : > { %p565_p10 = pnand %p563_p9, %p551_p13  ;;  %p572_p0 = por %p571_p12, %p570_p1 }
  0x23   : > { %p566_p6 = pneg %p565_p10 }
  0x25   : > { %p573_p4 = pnand %p572_p0, %p566_p6 }
  0x27   : > { %576 = shalt.err (!%p573_p4)
}
  0x28   : > { %s725_s11 = smov 64   ;;  %s726_s18 = smov 4  }
  0x29   : > { %475 = dma.hbm_to_vmem [thread:$0]  (!%p816_p11), %s1004_s1, 256, %s809_s26, [#allocation6], %s725_s11, %s725_s11, %s726_s18  }
  0x2a   : > { %s577_s4 = scalar_lea.hbm %s1005_s2, 16 }
  0x2b   : > { %p578_p1 = scmp.ne.s32.totalorder %s1005_s2, %s577_s4  ;;  %p584_p10 = scmp.lt.u32.totalorder %s577_s4, %s1005_s2 }
  0x2d   : > { %p580_p4 = pnand %p578_p1, %p551_p13 }
  0x2f   : > { %p581_p6 = pneg %p580_p4 }
  0x31   : > { %p586_p3 = pnand %p584_p10, %p581_p6 }
  0x33   : > { %589 = shalt.err (!%p586_p3)
}
  0x34   : > { %s590_s26 = scalar_lea.vmem %s820_s29, 16  ;;  %s597_s9 = scalar_lea.vmem %s820_s29, 32 }
  0x35   : > { %p591_p5 = scmp.ne.s32.totalorder %s820_s29, %s590_s26  ;;  %p598_p12 = scmp.lt.s32.totalorder %s820_s29, %s820_s29 }
  0x36   : > { %p599_p0 = scmp.lt.s32.totalorder %s597_s9, %s590_s26 }
  0x37   : > { %p593_p7 = pnand %p591_p5, %p551_p13 }
  0x38   : > { %p600_p1 = por %p599_p0, %p598_p12 }
  0x39   : > { %p594_p9 = pneg %p593_p7 }
  0x3b   : > { %p601_p4 = pnand %p600_p1, %p594_p9 }
  0x3d   : > { %604 = shalt.err (!%p601_p4)
}
  0x3e   : > { %478 = dma.hbm_to_vmem [thread:$0]  (!%p816_p11), %s1005_s2, 16, %s820_s29, [#allocation6]  }
  0x3f   : > { %s32_s18 = sadd.s32 1, %s717_s16  ;;  %s39_s19 = sadd.s32 1, %s709_s14 }
  0x40   : > { %p34_p13 = scmp.ge.s32.totalorder %s32_s18, 2  ;;  %p46_p6 = scmp.ne.s32.totalorder %s709_s14, %s705_s13 }
  0x41   : > { %p47_p10 = scmp.eq.s32.totalorder %s721_s17, 0  ;;  %p489_p3 = scmp.lt.s32.totalorder %s721_s17, 2 }
  0x42   : > { %s1030_s18 = smov (%p34_p13, %s32_s18), 0  ;;  %p885_p7 = por %p789_p2, %p46_p6 }
  0x43   : > { %p48_p5 = por %p47_p10, %p46_p6  ;;  %s36_s25 = ssub.s32 %s717_s16, %s1030_s18 }
  0x44   : > { %s1017_s27 = scalar_select %p885_p7, 1, 0 }
  0x45   : > { %s184_s28 = sand.u32 1, %s709_s14   ;;  %p37_p9 = scmp.eq.s32.totalorder %s36_s25, 0 }
  0x46   : > { %s434_s29 = sshll.u32 %s184_s28, 2  ;;  %s435_s30 = sshll.u32 %s717_s16, 6 }
  0x47   : > { %s894_s4 = scalar_select %p37_p9, %s709_s14, %s39_s19  }
  0x48   : > { %s899_s7 = scalar_lea.hbm %s1003_s0, %s435_s30  ;;  %s188_s21 = scalar_lea.vmem [#allocation2], %s434_s29 }
  0x49   : > { %s195_s8 = sshll.u32 %s188_s21, 4  ;;  %p903_p2 = pnand %p489_p3, %p48_p5  ;;  %s907_s8 = int_to_ptr.vmem [resolvable:$true] %s195_s8 }
  0x4a   : > { %s185_s9 = scalar_lea.sflag [#allocation3], %s184_s28  ;;  %s605_s10 = scalar_lea.hbm %s899_s7, 64 }
  0x4b   : > { %p606_p11 = scmp.ne.s32.totalorder %s899_s7, %s605_s10  ;;  %p607_p12 = pneg %p903_p2 }
  0x4c   : > { %s610_s25 = scalar_lea.hbm %s1003_s0, 128  ;;  %p611_p4 = scmp.lt.u32.totalorder %s899_s7, %s1003_s0 }
  0x4d   : > { %p608_p0 = pnand %p607_p12, %p606_p11  ;;  %p612_p13 = scmp.lt.u32.totalorder %s610_s25, %s605_s10 }
  0x4e   : > { %p614_p10 = scmp.lt.u32.totalorder %s605_s10, %s899_s7 }
  0x4f   : > { %p609_p1 = pneg %p608_p0  ;;  %p613_p6 = por %p612_p13, %p611_p4 }
  0x51   : > { %p615_p3 = por %p614_p10, %p613_p6 }
  0x53   : > { %p616_p5 = pnand %p615_p3, %p609_p1 }
  0x55   : > { %619 = shalt.err (!%p616_p5)
}
  0x56   : > { %s620_s28 = scalar_lea.vmem %s907_s8, 64  ;;  %s727_s5 = smov [#allocation2]  }
  0x57   : > { %p621_p9 = scmp.ne.s32.totalorder %s907_s8, %s620_s28  ;;  %s625_s6 = sshll.u32 %s727_s5, 4  ;;  %s626_s6 = int_to_ptr.vmem [resolvable:$false] %s625_s6 }
  0x58   : > { %s627_s21 = scalar_lea.vmem %s626_s6, 128  ;;  %p628_p7 = scmp.lt.s32.totalorder %s907_s8, %s626_s6 }
  0x59   : > { %p623_p11 = pnand %p621_p9, %p607_p12  ;;  %p629_p4 = scmp.lt.s32.totalorder %s627_s21, %s620_s28 }
  0x5b   : > { %p624_p0 = pneg %p623_p11  ;;  %p630_p13 = por %p629_p4, %p628_p7 }
  0x5d   : > { %p631_p6 = pnand %p630_p13, %p624_p0 }
  0x5f   : > { %634 = shalt.err (!%p631_p6)
}
  0x60   : > { %482 = dma.hbm_to_vmem [thread:$0]  (!%p903_p2), %s899_s7, 64, %s907_s8, %s185_s9  }
  0x61   : > { %204 = sbr.rel (%p805_p8) target bundleno = 345 (0x159), region = 32  ;;  %s937_s10 = sand.u32 (!%p805_p8), 1, %s705_s13  }
  0x62   : > { %s437_s11 = sshll.u32 (!%p805_p8), %s937_s10, 2  ;;  %s207_s19 = scalar_lea.sflag (!%p805_p8), [#allocation3], %s937_s10 }
  0x63   : > { %s210_s25 = scalar_lea.vmem (!%p805_p8), [#allocation2], %s437_s11  ;;  %p1019_p7 = scmp.ne.s32.totalorder (!%p805_p8), %s1013_s22, 0 }
  0x68   : > { %688 = dma.done.wait (%p1019_p7), %s207_s19, 64  }
  0x69   : > { %690 = vsyncadd (%p1019_p7), %s207_s19, 4294967232  ;;  %p1020_p12 = scmp.ne.s32.totalorder %s1011_s20, 0 }
  0x6b   : > { %692 = dma.done.wait (%p1020_p12), [#allocation6], 272  }
  0x6c   : > { %694 = vsyncadd (%p1020_p12), [#allocation6], 4294967024  ;;  %v728_v0 = vmov 0.0   ;;  %vm729_vm0 = vmmov 0   ;;  %v547_v1 = vld [vmem:[#allocation5] sm:$0xff]   ;;  %v548_v2 = vld [vmem:[#allocation5 + $0x8] sm:$0xff]  }
  0x6d   : > { %452 = vmatprep.subr.bf16.mxu0 %v728_v0  ;;  %456 = vmatprep.mubr.msk.bf16.mxu0 %vm729_vm0, %v728_v0  ;;  %v242_v3 = vld [vmem:[%s210_s25] sm:$0xf]  ;;  %vm266_vm1 = vcmask 261120   ;;  %s440_s22 = sshll.u32 %s937_s10, 3  ;;  %v441_v4 = vld [vmem:[#allocation7] ss:$0 sm:$0xff] }
  0x6e   : > { %453 = vmatpush3.bf16.msra.mxu0 %v547_v1  ;;  %s446_s20 = sshll.u32 %s713_s15, 7  ;;  %s240_s24 = scalar_lea.vmem [#allocation8], %s440_s22 }
  0x6f   : > { %454 = vmatprep.subr.bf16.mxu0 %v728_v0  ;;  %s326_s7 = sshll.u32 %s240_s24, 4  ;;  %s954_s9 = scalar_lea.hbm %s1006_s3, %s446_s20  ;;  %s956_s7 = int_to_ptr.vmem [resolvable:$true] %s326_s7 }
  0x70   : > { %s312_s29 = scalar_lea.sflag [#allocation4], %s937_s10  ;;  %s635_s15 = scalar_lea.vmem %s956_s7, 128 }
  0x71   : > { %p636_p8 = scmp.ne.s32.totalorder %s956_s7, %s635_s15  ;;  %p1021_p2 = scmp.ne.s32.totalorder %s1017_s27, 0 }
  0x72   : > { %455 = vmatpush3.bf16.msra.mxu0 %v548_v2  ;;  %s730_s30 = smov [#allocation8]  }
  0x73   : > { %p637_p1 = pnand %p636_p8, %p1021_p2  ;;  %s639_s28 = sshll.u32 %s730_s30, 4  ;;  %s640_s28 = int_to_ptr.vmem [resolvable:$false] %s639_s28 }
  0x74   : > { %s641_s5 = scalar_lea.vmem %s640_s28, 256  ;;  %p642_p3 = scmp.lt.s32.totalorder %s956_s7, %s640_s28 }
  0x75   : > { %457 = vmatmul.mubr.msk.bf16.vlgmr.msra.gmra.mrb[0].mxu0 %vm266_vm1, %v242_v3  ;;  %p638_p10 = pneg %p637_p1  ;;  %p643_p5 = scmp.lt.s32.totalorder %s641_s5, %s635_s15 }
  0x77   : > { %p644_p9 = por %p643_p5, %p642_p3 }
  0x79   : > { %p645_p11 = pnand %p644_p9, %p638_p10 }
 0x148   : > { %v304_v5 = vpop.f32.mrb[0].mxu0 }
 0x149   : > { %v305_v6 = vadd.f32 %v441_v4, %v304_v5  ;;  %v458_v7 = vpop.f32.mrb[1].mxu0 }
 0x14a   : > { %v307_v8 = vpop.f32.mrb[2].mxu0 }
 0x14b   : > { %v459_v9 = vpop.f32.mrb[3].mxu0  ;;  %310 = vst.msk [vmem:[%s240_s24] sm:$0xff] %vm266_vm1, %v305_v6 }
 0x14c   : > { %648 = shalt.err (!%p645_p11)
}
 0x14d   : > { %s649_s6 = scalar_lea.hbm %s954_s9, 128  ;;  %s653_s11 = scalar_lea.hbm %s1006_s3, 256 }
 0x14e   : > { %p650_p0 = scmp.ne.s32.totalorder %s954_s9, %s649_s6  ;;  %p654_p6 = scmp.lt.u32.totalorder %s954_s9, %s1006_s3 }
 0x14f   : > { %p655_p7 = scmp.lt.u32.totalorder %s653_s11, %s649_s6  ;;  %p657_p8 = scmp.lt.u32.totalorder %s649_s6, %s954_s9 }
 0x150   : > { %p651_p4 = pnand %p650_p0, %p1021_p2 }
 0x151   : > { %p656_p12 = por %p655_p7, %p654_p6 }
 0x152   : > { %p652_p13 = pneg %p651_p4 }
 0x153   : > { %p658_p1 = por %p657_p8, %p656_p12 }
 0x155   : > { %p659_p10 = pnand %p658_p1, %p652_p13 }
 0x157   : > { %662 = shalt.err (!%p659_p10)
}
 0x158   : > { %470 = dma.vmem_to_hbm [thread:$0]  (%p1021_p2), %s956_s7, 128, %s954_s9, %s312_s29  }
 0x159 PF: > { %s338_s22 = sand.u32 1, %s701_s12   ;;  %p1022_p3 = scmp.ne.s32.totalorder %s1014_s23, 0 }
 0x15a   : > { %p1023_p5 = scmp.ge.s32.totalorder %s721_s17, 2  ;;  %s339_s20 = scalar_lea.sflag [#allocation4], %s338_s22 }
 0x15c   : > { %p484_p9 = pnand %p1023_p5, %p1022_p3 }
 0x15e   : > { %696 = dma.done.wait (!%p484_p9), %s339_s20, 128  }
 0x15f   : > { %698 = vsyncadd (!%p484_p9), %s339_s20, 4294967168  ;;  %s20_s17 = sadd.s32 1, %s721_s17   ;;  %s1024_s12 = smov %s705_s13 }
 0x160   : > { %p17_p11 = scmp.ge.s32.totalorder %s20_s17, 4   ;;  %s1025_s13 = smov %s709_s14 }
 0x161   : > { %s1026_s14 = smov %s894_s4  ;;  %s1027_s15 = smov %s717_s16 }
 0x162   : > { %s1028_s16 = smov %s1030_s18  ;;  %19 = sbr.rel (!%p17_p11) target bundleno = 7 (0x7), region = 87 }
 0x169   :  { %344 = vsyncpa [#allocation3], 1 }
 0x16a   :  { %346 = vsyncpa [#allocation3 + $0x1], 1 }
 0x16b   :  { %347 = vsyncpa [#allocation6], 1 }
 0x16c   :  { %348 = vsyncpa [#allocation4], 1 }
 0x16d   :  { %350 = vsyncpa [#allocation4 + $0x1], 1 }

// kernel: mha_forward.3
= control target key start
LH: loop header
LB: loop body
LE: loop exit
PB: predicated region body
PF: predicated region fallthrough
CT: control target
= control target key end

     0   :  { %11 = vsyncpa [#allocation3], 0  ;;  %s1529_s0 = inlined_call_operand.hbm [shape: f32[16,32], index: 0, kind: input, shape index: {}]   ;;  %s1530_s1 = inlined_call_operand.hbm [shape: bf16[3,32,32], index: 1, kind: input, shape index: {}]   ;;  %s1531_s2 = inlined_call_operand.hbm [shape: f32[3,1,32], index: 2, kind: input, shape index: {}]   ;;  %s1532_s3 = inlined_call_operand.hbm [shape: bf16[16,32], index: 3, kind: output, shape index: {0}]   ;;  %s1533_s4 = inlined_call_operand.hbm [shape: bf16[16,32], index: 4, kind: output, shape index: {1}]   ;;  %s1534_s5 = inlined_call_operand.hbm [shape: bf16[16,32], index: 5, kind: output, shape index: {2}]  }
   0x1   :  { %13 = vsyncpa [#allocation3 + $0x1], 0 }
   0x2   :  { %14 = vsyncpa [#allocation6], 0 }
   0x3   :  { %15 = vsyncpa [#allocation4], 0 }
   0x4   :  { %17 = vsyncpa [#allocation4 + $0x1], 0 }
   0x5   :  { %18 = vsyncpa [#allocation10], 0 }
   0x6   :  { %20 = vsyncpa [#allocation10 + $0x1], 0  ;;  %s1193_s18 = smov 0   ;;  %s1195_s19 = smov 0  }
   0x7   :  { %s1197_s20 = smov 0   ;;  %s1199_s21 = smov 0  }
   0x8   :  { %s1201_s22 = smov 0   ;;  %s1203_s23 = smov 0  }
   0x9 LB: > { %s1224_s24 = sadd.s32 4294967295, %s1149_s23   ;;  %s1538_s25 = sadd.s32 4294967294, %s1149_s23   ;;  %s1149_s23 = sphi %s1203_s23, %s26_s23   ;;  %s1145_s22 = sphi %s1201_s22, %s1560_s22   ;;  %s1141_s21 = sphi %s1199_s21, %s1559_s21   ;;  %s1137_s20 = sphi %s1197_s20, %s1558_s20   ;;  %s1133_s19 = sphi %s1195_s19, %s1557_s19   ;;  %s1129_s18 = sphi %s1193_s18, %s1556_s18  }
   0xa   : > { %p58_p0 = scmp.ne.s32.totalorder %s1133_s19, %s1129_s18  ;;  %p1535_p1 = scmp.eq.s32.totalorder %s1224_s24, 0 }
   0xb   : > { %p142_p3 = scmp.eq.s32.totalorder %s1538_s25, 1  ;;  %p746_p5 = scmp.ge.s32.totalorder %s1149_s23, 1 }
   0xc   : > { %p1235_p4 = por %p1535_p1, %p58_p0  ;;  %p205_p7 = scmp.lt.s32.totalorder %s1149_s23, 3 }
   0xd   : > { %p1240_p6 = por %p142_p3, %p58_p0  ;;  %s1151_s29 = smov [#allocation5]  }
   0xe   : > { %s1540_s26 = scalar_select %p1235_p4, 1, 0 }
   0xf   : > { %s1541_s27 = scalar_select %p1240_p6, 1, 0 }
  0x10   : > { %p1245_p8 = pnand %p746_p5, %p205_p7  ;;  %s219_s30 = sshll.u32 %s1151_s29, 4  ;;  %s1249_s30 = int_to_ptr.vmem [resolvable:$true] %s219_s30 }
  0x11   : > { %s1152_s7 = smov [#allocation7]   ;;  %s917_s11 = scalar_lea.hbm %s1530_s1, 768 }
  0x12   : > { %p828_p9 = pneg %p1245_p8  ;;  %s234_s8 = sshll.u32 %s1152_s7, 4  ;;  %s1260_s8 = int_to_ptr.vmem [resolvable:$true] %s234_s8 }
  0x13   : > { %p918_p12 = scmp.ne.s32.totalorder %s1530_s1, %s917_s11  ;;  %p924_p5 = scmp.lt.u32.totalorder %s917_s11, %s1530_s1 }
  0x14   : > { %p1256_p11 = pnand %p828_p9, %p1535_p1 }
  0x16   : > { %p919_p13 = pneg %p1256_p11 }
  0x18   : > { %p920_p0 = pnand %p919_p13, %p918_p12 }
  0x1a   : > { %p921_p3 = pneg %p920_p0 }
  0x1c   : > { %p926_p7 = pnand %p924_p5, %p921_p3 }
  0x1e   : > { %929 = shalt.err (!%p926_p7)
}
  0x1f   : > { %s930_s16 = scalar_lea.vmem %s1249_s30, 768  ;;  %p938_p2 = scmp.lt.s32.totalorder %s1249_s30, %s1249_s30 }
  0x20   : > { %p931_p9 = scmp.ne.s32.totalorder %s1249_s30, %s930_s16  ;;  %p939_p12 = scmp.lt.s32.totalorder %s930_s16, %s930_s16 }
  0x22   : > { %p933_p10 = pnand %p931_p9, %p919_p13  ;;  %p940_p0 = por %p939_p12, %p938_p2 }
  0x24   : > { %p934_p1 = pneg %p933_p10 }
  0x26   : > { %p941_p6 = pnand %p940_p0, %p934_p1 }
  0x28   : > { %944 = shalt.err (!%p941_p6)
}
  0x29   : > { %s1153_s17 = smov 64   ;;  %s1154_s29 = smov 4  }
  0x2a   : > { %831 = dma.hbm_to_vmem [thread:$0]  (!%p1256_p11), %s1530_s1, 768, %s1249_s30, [#allocation6], %s1153_s17, %s1153_s17, %s1154_s29  }
  0x2b   : > { %s945_s12 = scalar_lea.hbm %s1531_s2, 48 }
  0x2c   : > { %p946_p2 = scmp.ne.s32.totalorder %s1531_s2, %s945_s12  ;;  %p952_p10 = scmp.lt.u32.totalorder %s945_s12, %s1531_s2 }
  0x2e   : > { %p948_p1 = pnand %p946_p2, %p919_p13 }
  0x30   : > { %p949_p6 = pneg %p948_p1 }
  0x32   : > { %p954_p3 = pnand %p952_p10, %p949_p6 }
  0x34   : > { %957 = shalt.err (!%p954_p3)
}
  0x35   : > { %s958_s30 = scalar_lea.vmem %s1260_s8, 48  ;;  %s965_s17 = scalar_lea.vmem %s1260_s8, 64 }
  0x36   : > { %p959_p5 = scmp.ne.s32.totalorder %s1260_s8, %s958_s30  ;;  %p966_p12 = scmp.lt.s32.totalorder %s1260_s8, %s1260_s8 }
  0x37   : > { %p967_p0 = scmp.lt.s32.totalorder %s965_s17, %s958_s30 }
  0x38   : > { %p961_p7 = pnand %p959_p5, %p919_p13 }
  0x39   : > { %p968_p2 = por %p967_p0, %p966_p12 }
  0x3a   : > { %p962_p9 = pneg %p961_p7 }
  0x3c   : > { %p969_p1 = pnand %p968_p2, %p962_p9 }
  0x3e   : > { %972 = shalt.err (!%p969_p1)
}
  0x3f   : > { %s1155_s29 = smov 16   ;;  %s1156_s7 = smov 1  }
  0x40   : > { %834 = dma.hbm_to_vmem [thread:$0]  (!%p1256_p11), %s1531_s2, 48, %s1260_s8, [#allocation6], %s1155_s29, %s1155_s29, %s1156_s7  }
  0x41   : > { %s38_s11 = sadd.s32 1, %s1145_s22  ;;  %s45_s12 = sadd.s32 1, %s1137_s20 }
  0x42   : > { %p40_p13 = scmp.ge.s32.totalorder %s38_s11, 2  ;;  %p52_p6 = scmp.ne.s32.totalorder %s1137_s20, %s1133_s19 }
  0x43   : > { %p53_p10 = scmp.eq.s32.totalorder %s1149_s23, 0  ;;  %p851_p3 = scmp.lt.s32.totalorder %s1149_s23, 2 }
  0x44   : > { %s1562_s11 = smov (%p40_p13, %s38_s11), 0  ;;  %p1544_p7 = scmp.eq.s32.totalorder %s1224_s24, 1 }
  0x45   : > { %p54_p5 = por %p53_p10, %p52_p6  ;;  %s42_s6 = ssub.s32 %s1145_s22, %s1562_s11 }
  0x46   : > { %p1325_p9 = por %p1544_p7, %p52_p6  ;;  %s248_s14 = sand.u32 1, %s1137_s20  }
  0x47   : > { %p43_p12 = scmp.eq.s32.totalorder %s42_s6, 0  ;;  %s750_s8 = sshll.u32 %s248_s14, 3 }
  0x48   : > { %s1545_s13 = scalar_select %p1325_p9, 1, 0 }
  0x49   : > { %s751_s15 = sshll.u32 %s1145_s22, 7  ;;  %s252_s7 = scalar_lea.vmem [#allocation2], %s750_s8 }
  0x4a   : > { %s1334_s16 = scalar_select %p43_p12, %s1137_s20, %s45_s12  }
  0x4b   : > { %s1339_s29 = scalar_lea.hbm %s1529_s0, %s751_s15  ;;  %s259_s9 = sshll.u32 %s252_s7, 4  ;;  %s1347_s9 = int_to_ptr.vmem [resolvable:$true] %s259_s9 }
  0x4c   : > { %p1343_p11 = pnand %p851_p3, %p54_p5  ;;  %s249_s12 = scalar_lea.sflag [#allocation3], %s248_s14 }
  0x4d   : > { %s973_s6 = scalar_lea.hbm %s1339_s29, 128  ;;  %s978_s30 = scalar_lea.hbm %s1529_s0, 256 }
  0x4e   : > { %p974_p0 = scmp.ne.s32.totalorder %s1339_s29, %s973_s6  ;;  %p975_p2 = pneg %p1343_p11 }
  0x4f   : > { %p979_p6 = scmp.lt.u32.totalorder %s1339_s29, %s1529_s0  ;;  %p980_p10 = scmp.lt.u32.totalorder %s978_s30, %s973_s6 }
  0x50   : > { %p976_p1 = pnand %p975_p2, %p974_p0  ;;  %p982_p5 = scmp.lt.u32.totalorder %s973_s6, %s1339_s29 }
  0x51   : > { %p981_p3 = por %p980_p10, %p979_p6 }
  0x52   : > { %p977_p13 = pneg %p976_p1 }
  0x53   : > { %p983_p7 = por %p982_p5, %p981_p3 }
  0x55   : > { %p984_p12 = pnand %p983_p7, %p977_p13 }
  0x57   : > { %987 = shalt.err (!%p984_p12)
}
  0x58   : > { %s988_s14 = scalar_lea.vmem %s1347_s9, 128  ;;  %s1157_s8 = smov [#allocation2]  }
  0x59   : > { %p989_p0 = scmp.ne.s32.totalorder %s1347_s9, %s988_s14  ;;  %s993_s15 = sshll.u32 %s1157_s8, 4  ;;  %s994_s15 = int_to_ptr.vmem [resolvable:$false] %s993_s15 }
  0x5a   : > { %s995_s17 = scalar_lea.vmem %s994_s15, 256  ;;  %p996_p4 = scmp.lt.s32.totalorder %s1347_s9, %s994_s15 }
  0x5b   : > { %p991_p1 = pnand %p989_p0, %p975_p2  ;;  %p997_p6 = scmp.lt.s32.totalorder %s995_s17, %s988_s14 }
  0x5d   : > { %p992_p9 = pneg %p991_p1  ;;  %p998_p10 = por %p997_p6, %p996_p4 }
  0x5f   : > { %p999_p3 = pnand %p998_p10, %p992_p9 }
  0x61   : > { %1002 = shalt.err (!%p999_p3)
}
  0x62   : > { %838 = dma.hbm_to_vmem [thread:$0]  (!%p1343_p11), %s1339_s29, 128, %s1347_s9, %s249_s12  }
  0x63   : > { %268 = sbr.rel (%p1245_p8) target bundleno = 398 (0x18e), region = 32  ;;  %s1377_s6 = sand.u32 (!%p1245_p8), 1, %s1133_s19  }
  0x64   : > { %s753_s30 = sshll.u32 (!%p1245_p8), %s1377_s6, 3  ;;  %s271_s7 = scalar_lea.sflag (!%p1245_p8), [#allocation3], %s1377_s6 }
  0x65   : > { %s274_s14 = scalar_lea.vmem (!%p1245_p8), [#allocation2], %s753_s30  ;;  %p1547_p4 = scmp.ne.s32.totalorder (!%p1245_p8), %s1540_s26, 0 }
  0x6a   : > { %1112 = dma.done.wait (%p1547_p4), %s271_s7, 128  }
  0x6b   : > { %1114 = vsyncadd (%p1547_p4), %s271_s7, 4294967168  ;;  %p1548_p9 = scmp.eq.s32.totalorder %s1224_s24, 0 }
  0x6d   : > { %1116 = dma.done.wait (%p1548_p9), [#allocation6], 816   ;;  %p1549_p11 = pmov %p1548_p9 }
  0x6e   : > { %v1158_v0 = vmov 0.0   ;;  %vm1159_vm0 = vmmov 0   ;;  %v911_v1 = vld [vmem:[#allocation5] sm:$0xff]   ;;  %v912_v2 = vld [vmem:[#allocation5 + $0x8] sm:$0xff]   ;;  %v913_v3 = vld [vmem:[#allocation5 + $0x10] sm:$0xff]   ;;  %vm345_vm1 = vcmask 261120  }
  0x6f   : > { %1118 = vsyncadd (%p1549_p11), [#allocation6], 4294966480  ;;  %788 = vmatprep.subr.bf16.mxu0 %v1158_v0  ;;  %796 = vmatprep.subr.bf16.mxu1 %v1158_v0  ;;  %v320_v4 = vld [vmem:[%s274_s14] sm:$0xff]  ;;  %v914_v7 = vld [vmem:[#allocation5 + $0x20] sm:$0xff]   ;;  %s1393_s26 = sshll.u32 %s1377_s6, 2  ;;  %s1396_s28 = sshll.u32 %s1141_s21, 6 }
  0x70   : > { %792 = vmatprep.mubr.msk.bf16.mxu0 %vm1159_vm0, %v1158_v0  ;;  %800 = vmatprep.mubr.msk.bf16.mxu1 %vm1159_vm0, %v1158_v0  ;;  %v321_v5 = vpack.c.bf16 %v320_v4, %v320_v4  ;;  %v915_v6 = vld [vmem:[#allocation5 + $0x18] sm:$0xff]   ;;  %v916_v8 = vld [vmem:[#allocation5 + $0x28] sm:$0xff]   ;;  %v759_v9 = vld [vmem:[#allocation7] ss:$0 sm:$0xff]  ;;  %s304_s29 = scalar_lea.vmem [#allocation8], %s1393_s26  ;;  %vm390_vm2 = vcmask 257024   ;;  %s1407_s17 = scalar_lea.hbm %s1532_s3, %s1396_s28 }
  0x71   : > { %789 = vmatpush3.bf16.msra.mxu0 %v911_v1  ;;  %797 = vmatpush3.bf16.msra.mxu1 %v913_v3  ;;  %v763_v11 = vld [vmem:[#allocation7 + $0x1] ss:$0 sm:$0xff]  ;;  %s551_s9 = sshll.u32 %s304_s29, 4  ;;  %s1539_s12 = scalar_lea.vmem [#allocation9], %s1393_s26  ;;  %v767_v23 = vld [vmem:[#allocation7 + $0x2] ss:$0 sm:$0xff]  ;;  %s1409_s9 = int_to_ptr.vmem [resolvable:$true] %s551_s9 }
  0x72   : > { %790 = vmatprep.subr.bf16.mxu0 %v1158_v0  ;;  %798 = vmatprep.subr.bf16.mxu1 %v1158_v0  ;;  %s565_s8 = sshll.u32 %s1539_s12, 4  ;;  %s1415_s14 = scalar_lea.hbm %s1533_s4, %s1396_s28  ;;  %s1417_s8 = int_to_ptr.vmem [resolvable:$true] %s565_s8 }
  0x73   : > { %s527_s21 = scalar_lea.sflag [#allocation4], %s1377_s6  ;;  %s1003_s15 = scalar_lea.vmem %s1409_s9, 64 }
  0x74   : > { %p1004_p8 = scmp.ne.s32.totalorder %s1409_s9, %s1003_s15  ;;  %p1550_p2 = scmp.ne.s32.totalorder %s1545_s13, 0 }
  0x75   : > { %791 = vmatpush3.bf16.msra.mxu0 %v912_v2  ;;  %799 = vmatpush3.bf16.msra.mxu1 %v915_v6  ;;  %s1160_s25 = smov [#allocation8]  }
  0x76   : > { %804 = vmatprep.subr.bf16.mxu0 %v1158_v0  ;;  %p1005_p13 = pnand %p1004_p8, %p1550_p2  ;;  %s1007_s10 = sshll.u32 %s1160_s25, 4  ;;  %s1008_s10 = int_to_ptr.vmem [resolvable:$false] %s1007_s10 }
  0x77   : > { %s1009_s12 = scalar_lea.vmem %s1008_s10, 128  ;;  %p1010_p7 = scmp.lt.s32.totalorder %s1409_s9, %s1008_s10 }
  0x78   : > { %793 = vmatmul.mubr.msk.bf16.vlgmr.msra.gmra.mrb[0].mxu0 %vm345_vm1, %v321_v5  ;;  %801 = vmatmul.mubr.msk.bf16.vlgmr.msra.gmra.mrb[0].mxu1 %vm345_vm1, %v321_v5  ;;  %p1006_p5 = pneg %p1005_p13  ;;  %p1011_p12 = scmp.lt.s32.totalorder %s1009_s12, %s1003_s15 }
  0x79   : > { %805 = vmatpush3.bf16.msra.mxu0 %v914_v7  ;;  %808 = vmatprep.mubr.msk.bf16.mxu0 %vm1159_vm0, %v1158_v0 }
  0x7a   : > { %806 = vmatprep.subr.bf16.mxu0 %v1158_v0  ;;  %p1012_p0 = por %p1011_p12, %p1010_p7 }
  0x7c   : > { %p1013_p1 = pnand %p1012_p0, %p1006_p5 }
  0x7d   : > { %807 = vmatpush3.bf16.msra.mxu0 %v916_v8 }
  0x80   : > { %809 = vmatmul.mubr.msk.bf16.vlgmr.msra.gmra.mrb[4].mxu0 %vm345_vm1, %v321_v5 }
 0x14b   : > { %v383_v10 = vpop.f32.mrb[0].mxu0  ;;  %v451_v15 = vpop.f32.mrb[0].mxu1 }
 0x14c   : > { %v384_v12 = vadd.f32 %v759_v9, %v383_v10  ;;  %v794_v13 = vpop.f32.mrb[1].mxu0  ;;  %v452_v18 = vadd.f32 %v763_v11, %v451_v15  ;;  %v802_v19 = vpop.f32.mrb[1].mxu1 }
 0x14d   : > { %v386_v14 = vpop.f32.mrb[2].mxu0  ;;  %v454_v20 = vpop.f32.mrb[2].mxu1 }
 0x14e   : > { %v389_v16 = vpack.c.bf16 %v384_v12, %v384_v12  ;;  %v795_v17 = vpop.f32.mrb[3].mxu0  ;;  %v457_v21 = vpack.c.bf16 %v452_v18, %v452_v18  ;;  %v803_v22 = vpop.f32.mrb[3].mxu1 }
 0x150   : > { %391 = vst.msk [vmem:[%s304_s29] sm:$0xf] %vm390_vm2, %v389_v16 }
 0x151   : > { %1016 = shalt.err (!%p1013_p1)
}
 0x152   : > { %s1017_s6 = scalar_lea.hbm %s1407_s17, 64  ;;  %s1021_s25 = scalar_lea.hbm %s1532_s3, 128 }
 0x153   : > { %p1018_p6 = scmp.ne.s32.totalorder %s1407_s17, %s1017_s6  ;;  %p1022_p4 = scmp.lt.u32.totalorder %s1407_s17, %s1532_s3 }
 0x154   : > { %p1023_p9 = scmp.lt.u32.totalorder %s1021_s25, %s1017_s6  ;;  %p1025_p8 = scmp.lt.u32.totalorder %s1017_s6, %s1407_s17 }
 0x155   : > { %p1019_p10 = pnand %p1018_p6, %p1550_p2 }
 0x156   : > { %p1024_p11 = por %p1023_p9, %p1022_p4 }
 0x157   : > { %p1020_p3 = pneg %p1019_p10 }
 0x158   : > { %p1026_p13 = por %p1025_p8, %p1024_p11 }
 0x15a   : > { %p1027_p5 = pnand %p1026_p13, %p1020_p3 }
 0x15c   : > { %1030 = shalt.err (!%p1027_p5)
}
 0x15d   : > { %822 = dma.vmem_to_hbm [thread:$0]  (%p1550_p2), %s1409_s9, 64, %s1407_s17, %s527_s21   ;;  %v518_v24 = vpop.f32.mrb[4].mxu0 }
 0x15e   : > { %s1551_s12 = scalar_lea.vmem [#allocation9], %s1393_s26  ;;  %s318_s15 = scalar_lea.vmem [#allocation11], %s1393_s26 }
 0x15f   : > { %458 = vst.msk [vmem:[%s1551_s12] sm:$0xf] %vm390_vm2, %v457_v21  ;;  %s1448_s6 = sshll.u32 %s318_s15, 4  ;;  %s1552_s29 = sand.u32 1, %s1224_s24   ;;  %s580_s6 = int_to_ptr.vmem [resolvable:$true] %s1448_s6 }
 0x160   : > { %s1452_s30 = scalar_lea.sflag [#allocation10], %s1552_s29  ;;  %s1031_s25 = scalar_lea.vmem %s1417_s8, 64 }
 0x161   : > { %p1032_p7 = scmp.ne.s32.totalorder %s1417_s8, %s1031_s25  ;;  %s1161_s7 = smov [#allocation9]  }
 0x162   : > { %s1035_s10 = sshll.u32 %s1161_s7, 4  ;;  %s1036_s10 = int_to_ptr.vmem [resolvable:$false] %s1035_s10 }
 0x163   : > { %p1033_p12 = pnand %p1032_p7, %p1550_p2  ;;  %s1037_s9 = scalar_lea.vmem %s1036_s10, 128 }
 0x164   : > { %p1038_p1 = scmp.lt.s32.totalorder %s1417_s8, %s1036_s10  ;;  %p1039_p6 = scmp.lt.s32.totalorder %s1037_s9, %s1031_s25 }
 0x165   : > { %p1034_p0 = pneg %p1033_p12 }
 0x166   : > { %p1040_p10 = por %p1039_p6, %p1038_p1 }
 0x168   : > { %p1041_p3 = pnand %p1040_p10, %p1034_p0 }
 0x16a   : > { %1044 = shalt.err (!%p1041_p3)
}
 0x16b   : > { %s1045_s24 = scalar_lea.hbm %s1415_s14, 64  ;;  %s1049_s12 = scalar_lea.hbm %s1533_s4, 128 }
 0x16c   : > { %p1046_p4 = scmp.ne.s32.totalorder %s1415_s14, %s1045_s24  ;;  %p1050_p8 = scmp.lt.u32.totalorder %s1415_s14, %s1533_s4 }
 0x16d   : > { %p1051_p13 = scmp.lt.u32.totalorder %s1049_s12, %s1045_s24  ;;  %p1053_p7 = scmp.lt.u32.totalorder %s1045_s24, %s1415_s14 }
 0x16e   : > { %p1047_p9 = pnand %p1046_p4, %p1550_p2 }
 0x16f   : > { %p1052_p5 = por %p1051_p13, %p1050_p8 }
 0x170   : > { %p1048_p11 = pneg %p1047_p9 }
 0x171   : > { %p1054_p12 = por %p1053_p7, %p1052_p5 }
 0x173   : > { %p1055_p0 = pnand %p1054_p12, %p1048_p11 }
 0x175   : > { %1058 = shalt.err (!%p1055_p0)
}
 0x176   : > { %823 = dma.vmem_to_hbm [thread:$0]  (%p1550_p2), %s1417_s8, 64, %s1415_s14, %s1452_s30   ;;  %v519_v25 = vadd.f32 %v767_v23, %v518_v24  ;;  %v810_v26 = vpop.f32.mrb[5].mxu0 }
 0x177   : > { %v521_v27 = vpop.f32.mrb[6].mxu0  ;;  %s1480_s9 = scalar_lea.hbm %s1534_s5, %s1396_s28  ;;  %s1059_s24 = scalar_lea.vmem %s580_s6, 64 }
 0x178   : > { %v524_v28 = vpack.c.bf16 %v519_v25, %v519_v25  ;;  %v811_v29 = vpop.f32.mrb[7].mxu0  ;;  %p1060_p1 = scmp.ne.s32.totalorder %s580_s6, %s1059_s24  ;;  %s1162_s8 = smov [#allocation11]  }
 0x179   : > { %s1063_s14 = sshll.u32 %s1162_s8, 4  ;;  %s1064_s14 = int_to_ptr.vmem [resolvable:$false] %s1063_s14 }
 0x17a   : > { %525 = vst.msk [vmem:[%s318_s15] sm:$0xf] %vm390_vm2, %v524_v28  ;;  %p1061_p6 = pnand %p1060_p1, %p1550_p2  ;;  %s1065_s17 = scalar_lea.vmem %s1064_s14, 128 }
 0x17b   : > { %p1066_p3 = scmp.lt.s32.totalorder %s580_s6, %s1064_s14  ;;  %p1067_p4 = scmp.lt.s32.totalorder %s1065_s17, %s1059_s24 }
 0x17c   : > { %p1062_p10 = pneg %p1061_p6 }
 0x17d   : > { %p1068_p9 = por %p1067_p4, %p1066_p3 }
 0x17f   : > { %p1069_p11 = pnand %p1068_p9, %p1062_p10 }
 0x181   : > { %1072 = shalt.err (!%p1069_p11)
}
 0x182   : > { %s1073_s26 = scalar_lea.hbm %s1480_s9, 64  ;;  %s1077_s21 = scalar_lea.hbm %s1534_s5, 128 }
 0x183   : > { %p1074_p8 = scmp.ne.s32.totalorder %s1480_s9, %s1073_s26  ;;  %p1078_p7 = scmp.lt.u32.totalorder %s1480_s9, %s1534_s5 }
 0x184   : > { %p1079_p12 = scmp.lt.u32.totalorder %s1077_s21, %s1073_s26  ;;  %p1081_p1 = scmp.lt.u32.totalorder %s1073_s26, %s1480_s9 }
 0x185   : > { %p1075_p13 = pnand %p1074_p8, %p1550_p2 }
 0x186   : > { %p1080_p0 = por %p1079_p12, %p1078_p7 }
 0x187   : > { %p1076_p5 = pneg %p1075_p13 }
 0x188   : > { %p1082_p6 = por %p1081_p1, %p1080_p0 }
 0x18a   : > { %p1083_p10 = pnand %p1082_p6, %p1076_p5 }
 0x18c   : > { %1086 = shalt.err (!%p1083_p10)
}
 0x18d   : > { %824 = dma.vmem_to_hbm [thread:$0]  (%p1550_p2), %s580_s6, 64, %s1480_s9, %s1452_s30  }
 0x18e PF: > { %s591_s7 = sand.u32 1, %s1129_s18   ;;  %p1553_p3 = scmp.ne.s32.totalorder %s1541_s27, 0 }
 0x18f   : > { %p1554_p4 = scmp.ge.s32.totalorder %s1149_s23, 2  ;;  %s592_s25 = scalar_lea.sflag [#allocation4], %s591_s7 }
 0x191   : > { %p840_p9 = pnand %p1554_p4, %p1553_p3 }
 0x193   : > { %1120 = dma.done.wait (!%p840_p9), %s592_s25, 64  }
 0x194   : > { %1122 = vsyncadd (!%p840_p9), %s592_s25, 4294967232  ;;  %s1555_s10 = sadd.s32 4294967294, %s1149_s23  }
 0x195   : > { %s600_s24 = sand.u32 1, %s1555_s10  }
 0x196   : > { %s601_s8 = scalar_lea.sflag [#allocation10], %s600_s24 }
 0x197   : > { %1124 = dma.done.wait (!%p840_p9), %s601_s8, 128  }
 0x198   : > { %1126 = vsyncadd (!%p840_p9), %s601_s8, 4294967168  ;;  %s26_s23 = sadd.s32 1, %s1149_s23   ;;  %s1556_s18 = smov %s1133_s19 }
 0x199   : > { %p23_p2 = scmp.ge.s32.totalorder %s26_s23, 4   ;;  %s1557_s19 = smov %s1137_s20 }
 0x19a   : > { %s1558_s20 = smov %s1334_s16  ;;  %s1559_s21 = smov %s1145_s22 }
 0x19b   : > { %s1560_s22 = smov %s1562_s11  ;;  %25 = sbr.rel (!%p23_p2) target bundleno = 9 (0x9), region = 123 }
 0x1a2   :  { %615 = vsyncpa [#allocation3], 1 }
 0x1a3   :  { %617 = vsyncpa [#allocation3 + $0x1], 1 }
 0x1a4   :  { %618 = vsyncpa [#allocation6], 1 }
 0x1a5   :  { %619 = vsyncpa [#allocation4], 1 }
 0x1a6   :  { %621 = vsyncpa [#allocation4 + $0x1], 1 }
 0x1a7   :  { %622 = vsyncpa [#allocation10], 1 }
 0x1a8   :  { %624 = vsyncpa [#allocation10 + $0x1], 1 }

// kernel: mha_forward.4
= control target key start
LH: loop header
LB: loop body
LE: loop exit
PB: predicated region body
PF: predicated region fallthrough
CT: control target
= control target key end

     0   :  { %s2271_s0 = inlined_call_operand.hbm [shape: bf16[2,8,8,4], index: 0, kind: input, shape index: {}]   ;;  %s2272_s1 = inlined_call_operand.hbm [shape: bf16[2,8,8,4], index: 1, kind: input, shape index: {}]   ;;  %s2273_s2 = inlined_call_operand.hbm [shape: bf16[2,8,8,4], index: 2, kind: input, shape index: {}]   ;;  %s2274_s3 = inlined_call_operand.hbm [shape: bf16[2,8,32], index: 3, kind: output, shape index: {}]  }
   0x1   :  { %2284 = sst [smem:[#allocation15_spill]] %s2272_s1 }
   0x2   :  { %8 = vsyncpa [#allocation3], 0 }
   0x3   :  { %10 = vsyncpa [#allocation3 + $0x1], 0 }
   0x4   :  { %11 = vsyncpa [#allocation6], 0 }
   0x5   :  { %13 = vsyncpa [#allocation6 + $0x1], 0 }
   0x6   :  { %14 = vsyncpa [#allocation4], 0 }
   0x7   :  { %16 = vsyncpa [#allocation4 + $0x1], 0  ;;  %s1822_s12 = smov 0   ;;  %s1824_s13 = smov 0  }
   0x8   :  { %s1826_s14 = smov 0   ;;  %s1828_s15 = smov 0  }
   0x9   :  { %s1830_s16 = smov 0   ;;  %s1832_s17 = smov 0  }
   0xa LB: > { %2285 = sst [smem:[#allocation12_spill]] %s1781_s16  ;;  %s1853_s18 = sadd.s32 4294967295, %s1785_s17   ;;  %s1785_s17 = sphi %s1832_s17, %s22_s17   ;;  %s1781_s16 = sphi %s1830_s16, %s2308_s16   ;;  %s1777_s15 = sphi %s1828_s15, %s2307_s15   ;;  %s1773_s14 = sphi %s1826_s14, %s2311_s14   ;;  %s1769_s13 = sphi %s1824_s13, %s2310_s13   ;;  %s1765_s12 = sphi %s1822_s12, %s2309_s12  }
   0xb   : > { %s1326_s19 = sadd.s32 4294967294, %s1785_s17   ;;  %s34_s20 = sadd.s32 1, %s1781_s16 }
   0xc   : > { %s43_s21 = sadd.s32 1, %s1773_s14  ;;  %p36_p0 = scmp.ge.s32.totalorder %s34_s20, 2 }
   0xd   : > { %p50_p1 = scmp.ne.s32.totalorder %s1773_s14, %s1769_s13  ;;  %p51_p2 = scmp.eq.s32.totalorder %s1785_s17, 0 }
   0xe   : > { %p56_p3 = scmp.ne.s32.totalorder %s1769_s13, %s1765_s12  ;;  %s2313_s20 = smov (%p36_p0, %s34_s20), 0 }
   0xf   : > { %2286 = sst [smem:[#allocation13_spill]] %s2313_s20  ;;  %p1865_p4 = por %p51_p2, %p50_p1 }
  0x10   : > { %p57_p5 = scmp.eq.s32.totalorder %s1853_s18, 0  ;;  %s38_s23 = ssub.s32 %s1781_s16, %s2313_s20 }
  0x11   : > { %p134_p6 = scmp.eq.s32.totalorder %s1853_s18, 1  ;;  %p41_p7 = scmp.eq.s32.totalorder %s38_s23, 0 }
  0x12   : > { %p1873_p8 = por %p57_p5, %p56_p3  ;;  %p140_p10 = scmp.eq.s32.totalorder %s1326_s19, 1 }
  0x13   : > { %p1877_p9 = por %p134_p6, %p50_p1  ;;  %p1516_p13 = scmp.lt.s32.totalorder %s1785_s17, 2 }
  0x14   : > { %s2288_s24 = scalar_select %p1873_p8, 1, 0 }
  0x15   : > { %s2289_s25 = scalar_select %p1877_p9, 1, 0 }
  0x16   : > { %s1882_s26 = scalar_select %p41_p7, %s1773_s14, %s43_s21  }
  0x17   : > { %p1884_p11 = por %p140_p10, %p56_p3  ;;  %s2277_s28 = sand.u32 1, %s1773_s14  }
  0x18   : > { %2290 = sst [smem:[#allocation14_spill]] %s1882_s26  ;;  %s1893_s29 = sshll.u32 %s2277_s28, 5 }
  0x19   : > { %s2291_s27 = scalar_select %p1884_p11, 1, 0 }
  0x1a   : > { %s1896_s30 = sshll.u32 %s1781_s16, 9  ;;  %p1900_p0 = pnand %p1516_p13, %p1865_p4 }
  0x1b   : > { %s182_s5 = sand.u32 1, %s1785_s17   ;;  %s2293_s1 = sld [smem:[#allocation15_spill]] }
  0x1c   : > { %s186_s9 = scalar_lea.vmem [#allocation5], %s1893_s29  ;;  %s1916_s11 = scalar_lea.sflag [#allocation6], %s182_s5 }
  0x1d   : > { %s193_s10 = sshll.u32 %s186_s9, 4  ;;  %p1922_p4 = pneg %p1900_p0  ;;  %s1913_s10 = int_to_ptr.vmem [resolvable:$true] %s193_s10 }
  0x21   : > { %s1909_s8 = scalar_lea.hbm %s2293_s1, %s1896_s30  ;;  %s1614_s6 = scalar_lea.hbm %s2293_s1, 1024 }
  0x22   : > { %s1609_s19 = scalar_lea.hbm %s1909_s8, 512  ;;  %p1615_p7 = scmp.lt.u32.totalorder %s1909_s8, %s2293_s1 }
  0x23   : > { %p1610_p3 = scmp.ne.s32.totalorder %s1909_s8, %s1609_s19  ;;  %p1616_p10 = scmp.lt.u32.totalorder %s1614_s6, %s1609_s19 }
  0x24   : > { %p1618_p12 = scmp.lt.u32.totalorder %s1609_s19, %s1909_s8 }
  0x25   : > { %p1612_p5 = pnand %p1922_p4, %p1610_p3  ;;  %p1617_p13 = por %p1616_p10, %p1615_p7 }
  0x27   : > { %p1613_p6 = pneg %p1612_p5  ;;  %p1619_p1 = por %p1618_p12, %p1617_p13 }
  0x29   : > { %p1620_p2 = pnand %p1619_p1, %p1613_p6 }
  0x2b   : > { %1623 = shalt.err (!%p1620_p2)
}
  0x2c   : > { %s1624_s5 = scalar_lea.vmem %s1913_s10, 512  ;;  %s1787_s22 = smov [#allocation5]  }
  0x2d   : > { %p1625_p3 = scmp.ne.s32.totalorder %s1913_s10, %s1624_s5  ;;  %s1629_s23 = sshll.u32 %s1787_s22, 4  ;;  %s1630_s23 = int_to_ptr.vmem [resolvable:$false] %s1629_s23 }
  0x2e   : > { %s1631_s7 = scalar_lea.vmem %s1630_s23, 1024  ;;  %p1632_p9 = scmp.lt.s32.totalorder %s1913_s10, %s1630_s23 }
  0x2f   : > { %p1627_p5 = pnand %p1625_p3, %p1922_p4  ;;  %p1633_p8 = scmp.lt.s32.totalorder %s1631_s7, %s1624_s5 }
  0x31   : > { %p1628_p11 = pneg %p1627_p5  ;;  %p1634_p7 = por %p1633_p8, %p1632_p9 }
  0x33   : > { %p1635_p10 = pnand %p1634_p7, %p1628_p11 }
  0x35   : > { %1638 = shalt.err (!%p1635_p10)
}
  0x36   : > { %s2278_s19 = smov 64   ;;  %s2280_s6 = smov 4  }
  0x37   : > { %1508 = dma.hbm_to_vmem [thread:$0]  (!%p1900_p0), %s1909_s8, 512, %s1913_s10, %s1916_s11, %s2278_s19, %s2278_s19, %s2280_s6  }
  0x38   : > { %p2295_p8 = scmp.lt.s32.totalorder %s1785_s17, 3  ;;  %p2296_p9 = scmp.ge.s32.totalorder %s1785_s17, 1 }
  0x39   : > { %s1961_s23 = scalar_lea.hbm %s2271_s0, %s1896_s30  ;;  %s164_s7 = scalar_lea.vmem [#allocation2], %s1893_s29 }
  0x3a   : > { %p1953_p11 = pnand %p2296_p9, %p2295_p8  ;;  %s172_s28 = sshll.u32 %s164_s7, 4  ;;  %s1964_s28 = int_to_ptr.vmem [resolvable:$true] %s172_s28 }
  0x3b   : > { %s1970_s19 = scalar_lea.hbm %s2273_s2, %s1896_s30  ;;  %s2298_s6 = sand.u32 1, %s1773_s14  }
  0x3c   : > { %s2297_s9 = scalar_select %p1953_p11, 1, 0 }
  0x3d   : > { %s1974_s1 = scalar_lea.sflag [#allocation3], %s2298_s6  ;;  %s1639_s20 = scalar_lea.hbm %s1961_s23, 512 }
  0x3e   : > { %p1640_p12 = scmp.ne.s32.totalorder %s1961_s23, %s1639_s20  ;;  %s1644_s16 = scalar_lea.hbm %s2271_s0, 1024 }
  0x3f   : > { %p1645_p6 = scmp.lt.u32.totalorder %s1961_s23, %s2271_s0  ;;  %p1646_p13 = scmp.lt.u32.totalorder %s1644_s16, %s1639_s20 }
  0x40   : > { %p1642_p1 = pnand %p1640_p12, %p1922_p4  ;;  %p1648_p5 = scmp.lt.u32.totalorder %s1639_s20, %s1961_s23 }
  0x41   : > { %p1647_p3 = por %p1646_p13, %p1645_p6 }
  0x42   : > { %p1643_p2 = pneg %p1642_p1 }
  0x43   : > { %p1649_p7 = por %p1648_p5, %p1647_p3 }
  0x45   : > { %p1650_p10 = pnand %p1649_p7, %p1643_p2 }
  0x47   : > { %1653 = shalt.err (!%p1650_p10)
}
  0x48   : > { %s1654_s30 = scalar_lea.vmem %s1964_s28, 512  ;;  %s1790_s6 = smov [#allocation2]  }
  0x49   : > { %p1655_p8 = scmp.ne.s32.totalorder %s1964_s28, %s1654_s30  ;;  %s1659_s8 = sshll.u32 %s1790_s6, 4  ;;  %s1660_s8 = int_to_ptr.vmem [resolvable:$false] %s1659_s8 }
  0x4a   : > { %s1661_s26 = scalar_lea.vmem %s1660_s8, 1024  ;;  %p1662_p1 = scmp.lt.s32.totalorder %s1964_s28, %s1660_s8 }
  0x4b   : > { %p1657_p9 = pnand %p1655_p8, %p1922_p4  ;;  %p1663_p11 = scmp.lt.s32.totalorder %s1661_s26, %s1654_s30 }
  0x4d   : > { %p1658_p12 = pneg %p1657_p9  ;;  %p1664_p6 = por %p1663_p11, %p1662_p1 }
  0x4f   : > { %p1665_p13 = pnand %p1664_p6, %p1658_p12 }
  0x51   : > { %1668 = shalt.err (!%p1665_p13)
}
  0x52   : > { %s2299_s16 = smov 4   ;;  %s2300_s20 = smov 64  }
  0x53   : > { %1505 = dma.hbm_to_vmem [thread:$0]  (!%p1900_p0), %s1961_s23, 512, %s1964_s28, %s1974_s1, %s2300_s20, %s2300_s20, %s2299_s16  }
  0x54   : > { %s207_s10 = scalar_lea.vmem [#allocation7], %s1893_s29  ;;  %s1669_s22 = scalar_lea.hbm %s1970_s19, 512 }
  0x55   : > { %s214_s5 = sshll.u32 %s207_s10, 4  ;;  %p1670_p11 = scmp.ne.s32.totalorder %s1970_s19, %s1669_s22  ;;  %s2002_s5 = int_to_ptr.vmem [resolvable:$true] %s214_s5 }
  0x56   : > { %s1674_s6 = scalar_lea.hbm %s2273_s2, 1024  ;;  %p1675_p5 = scmp.lt.u32.totalorder %s1970_s19, %s2273_s2 }
  0x57   : > { %p1672_p2 = pnand %p1670_p11, %p1922_p4  ;;  %p1676_p7 = scmp.lt.u32.totalorder %s1674_s6, %s1669_s22 }
  0x58   : > { %p1678_p8 = scmp.lt.u32.totalorder %s1669_s22, %s1970_s19 }
  0x59   : > { %p1673_p3 = pneg %p1672_p2  ;;  %p1677_p10 = por %p1676_p7, %p1675_p5 }
  0x5b   : > { %p1679_p9 = por %p1678_p8, %p1677_p10 }
  0x5d   : > { %p1680_p12 = pnand %p1679_p9, %p1673_p3 }
  0x5f   : > { %1683 = shalt.err (!%p1680_p12)
}
  0x60   : > { %s1684_s1 = scalar_lea.vmem %s2002_s5, 512  ;;  %s1791_s28 = smov [#allocation7]  }
  0x61   : > { %p1685_p1 = scmp.ne.s32.totalorder %s2002_s5, %s1684_s1  ;;  %s1689_s29 = sshll.u32 %s1791_s28, 4  ;;  %s1690_s29 = int_to_ptr.vmem [resolvable:$false] %s1689_s29 }
  0x62   : > { %s1691_s23 = scalar_lea.vmem %s1690_s29, 1024  ;;  %p1692_p11 = scmp.lt.s32.totalorder %s2002_s5, %s1690_s29 }
  0x63   : > { %p1687_p6 = pnand %p1685_p1, %p1922_p4  ;;  %p1693_p2 = scmp.lt.s32.totalorder %s1691_s23, %s1684_s1 }
  0x65   : > { %p1688_p13 = pneg %p1687_p6  ;;  %p1694_p5 = por %p1693_p2, %p1692_p11 }
  0x67   : > { %p1695_p7 = pnand %p1694_p5, %p1688_p13 }
  0x69   : > { %1698 = shalt.err (!%p1695_p7)
}
  0x6a   : > { %1511 = dma.hbm_to_vmem [thread:$0]  (!%p1900_p0), %s1970_s19, 512, %s2002_s5, %s1916_s11, %s2300_s20, %s2300_s20, %s2299_s16  }
  0x6b   : > { %p2301_p4 = scmp.ne.s32.totalorder %s2297_s9, 0 }
  0x6c   : > { %s2032_s21 = sand.u32 (!%p2301_p4), 1, %s1769_s13   ;;  %p2302_p3 = scmp.ne.s32.totalorder (!%p2301_p4), %s2288_s24, 0 }
  0x6d   : > { %226 = sbr.rel (%p2301_p4) target bundleno = 876 (0x36c), region = 32  ;;  %s2035_s10 = sshll.u32 (!%p2301_p4), %s2032_s21, 5 }
  0x6e   : > { %s229_s4 = scalar_lea.sflag (!%p2301_p4), [#allocation3], %s2032_s21  ;;  %s2039_s22 = scalar_lea.vmem (!%p2301_p4), [#allocation2], %s2035_s10 }
  0x74   : > { %1752 = dma.done.wait (%p2302_p3), %s229_s4, 512  }
  0x75   : > { %1754 = vsyncadd (%p2302_p3), %s229_s4, 4294966784  ;;  %s237_s11 = sand.u32 1, %s1853_s18   ;;  %s2047_s9 = scalar_lea.vmem [#allocation5], %s2035_s10 }
  0x76   : > { %s238_s19 = scalar_lea.sflag [#allocation6], %s237_s11 }
  0x77   : > { %1756 = dma.done.wait (%p2302_p3), %s238_s19, 1024  }
  0x78   : > { %1758 = vsyncadd (%p2302_p3), %s238_s19, 4294966272  ;;  %v1792_v0 = vmov 0.0   ;;  %vm1793_vm0 = vmmov 0   ;;  %vm308_vm1 = vcmask 31744   ;;  %v292_v1 = vld [vmem:[%s2047_s9] sm:$0xf] }
  0x79   : > { %1398 = vmatprep.subr.bf16.mxu0 %v1792_v0  ;;  %1404 = vmatprep.subr.bf16.mxu1 %v1792_v0  ;;  %v293_v2 = vld [vmem:[%s2047_s9 + $0x4] sm:$0xf]  ;;  %v313_v3 = vsel %vm308_vm1, %v292_v1, 0  ;;  %v294_v5 = vld [vmem:[%s2047_s9 + $0x8] sm:$0xf]  ;;  %vm677_vm2 = vcmask 64512  }
  0x7a   : > { %1400 = vmatprep.mubr.msk.bf16.mxu0 %vm1793_vm0, %v1792_v0  ;;  %1406 = vmatprep.mubr.msk.bf16.mxu1 %vm1793_vm0, %v1792_v0  ;;  %v359_v4 = vsel %vm308_vm1, %v293_v2, 0  ;;  %v295_v6 = vld [vmem:[%s2047_s9 + $0xc] sm:$0xf]  ;;  %v284_v7 = vld [vmem:[%s2039_s22] sm:$0xf]  ;;  %v405_v9 = vsel %vm308_vm1, %v294_v5, 0 }
  0x7b   : > { %1399 = vmatpush3.bf16.xpose.msra.mxu0 %v313_v3  ;;  %1405 = vmatpush3.bf16.xpose.msra.mxu1 %v359_v4  ;;  %v285_v8 = vld [vmem:[%s2039_s22 + $0x4] sm:$0xf]  ;;  %v451_v10 = vsel %vm308_vm1, %v295_v6, 0  ;;  %v296_v11 = vld [vmem:[%s2047_s9 + $0x10] sm:$0xf]  ;;  %s250_s18 = scalar_lea.vmem [#allocation7], %s2035_s10 }
  0x7c   : > { %1410 = vmatprep.subr.bf16.mxu0 %v1792_v0  ;;  %1416 = vmatprep.subr.bf16.mxu1 %v1792_v0  ;;  %v297_v12 = vld [vmem:[%s2047_s9 + $0x14] sm:$0xf]  ;;  %v286_v13 = vld [vmem:[%s2039_s22 + $0x8] sm:$0xf]  ;;  %v287_v14 = vld [vmem:[%s2039_s22 + $0xc] sm:$0xf] }
  0x7d   : > { %v497_v15 = vsel %vm308_vm1, %v296_v11, 0  ;;  %v543_v16 = vsel %vm308_vm1, %v297_v12, 0  ;;  %v298_v17 = vld [vmem:[%s2047_s9 + $0x18] sm:$0xf]  ;;  %v299_v18 = vld [vmem:[%s2047_s9 + $0x1c] sm:$0xf] }
  0x7e   : > { %v288_v19 = vld [vmem:[%s2039_s22 + $0x10] sm:$0xf]  ;;  %v289_v20 = vld [vmem:[%s2039_s22 + $0x14] sm:$0xf]  ;;  %v589_v21 = vsel %vm308_vm1, %v298_v17, 0  ;;  %v635_v22 = vsel %vm308_vm1, %v299_v18, 0 }
  0x7f   : > { %v290_v23 = vld [vmem:[%s2039_s22 + $0x18] sm:$0xf]  ;;  %v291_v24 = vld [vmem:[%s2039_s22 + $0x1c] sm:$0xf]  ;;  %v300_v2 = vld [vmem:[%s250_s18] sm:$0xf] }
  0x80   : > { %vm761_vm3 = vcmask 1043456   ;;  %v301_v4 = vld [vmem:[%s250_s18 + $0x4] sm:$0xf]  ;;  %v302_v6 = vld [vmem:[%s250_s18 + $0x8] sm:$0xf]  ;;  %s1794_s24 = smov 4  }
  0x81   : > { %v763_v3 = vsel %vm761_vm3, %v300_v2, 0  ;;  %v809_v5 = vsel %vm761_vm3, %v301_v4, 0  ;;  %v305_v11 = vld [vmem:[%s250_s18 + $0x14] sm:$0xf]  ;;  %s1795_s16 = smov 8   ;;  %s1796_s20 = smov 12  }
  0x82   : > { %1401 = vmatmul.mubr.msk.bf16.vlgmr.msra.gmra.mrb[0].mxu0 %vm308_vm1, %v284_v7  ;;  %1407 = vmatmul.mubr.msk.bf16.vlgmr.msra.gmra.mrb[0].mxu1 %vm308_vm1, %v285_v8  ;;  %v303_v7 = vld [vmem:[%s250_s18 + $0xc] sm:$0xf]  ;;  %v855_v8 = vsel %vm761_vm3, %v302_v6, 0  ;;  %s1797_s5 = smov 16   ;;  %s1798_s7 = smov 20   ;;  %vm1173_vm4 = vcmask 97280  }
  0x83   : > { %1411 = vmatpush3.bf16.xpose.msra.mxu0 %v405_v9  ;;  %1417 = vmatpush3.bf16.xpose.msra.mxu1 %v451_v10  ;;  %v901_v9 = vsel %vm761_vm3, %v303_v7, 0  ;;  %v304_v10 = vld [vmem:[%s250_s18 + $0x10] sm:$0xf]  ;;  %s1799_s30 = smov 24   ;;  %s1800_s6 = smov 28   ;;  %vm1175_vm5 = vcmask 130048  }
  0x84   : > { %1412 = vmatprep.mubr.msk.bf16.mxu0 %vm1793_vm0, %v1792_v0  ;;  %1418 = vmatprep.mubr.msk.bf16.mxu1 %vm1793_vm0, %v1792_v0  ;;  %v947_v12 = vsel %vm761_vm3, %v304_v10, 0  ;;  %s1342_s8 = sshll.u32 %s2032_s21, 2  ;;  %vm1177_vm6 = vcmask 162816   ;;  %vm1179_vm7 = vcmask 195584   ;;  %vm1181_vm8 = vcmask 228352   ;;  %s1360_s26 = sshll.u32 %s1777_s15, 6 }
  0x85   : > { %1422 = vmatprep.subr.bf16.mxu0 %v1792_v0  ;;  %1428 = vmatprep.subr.bf16.mxu1 %v1792_v0  ;;  %s282_s1 = scalar_lea.vmem [#allocation8], %s1342_s8  ;;  %vm1184_vm9 = vcmask 257024   ;;  %s2222_s10 = scalar_lea.hbm %s2274_s3, %s1360_s26 }
  0x86   : > { %s1201_s28 = sshll.u32 %s282_s1, 4  ;;  %s1187_s4 = scalar_lea.sflag [#allocation4], %s2032_s21  ;;  %s2224_s28 = int_to_ptr.vmem [resolvable:$true] %s1201_s28 }
  0x87   : > { %s1699_s15 = scalar_lea.vmem %s2224_s28, 64  ;;  %p2303_p10 = scmp.ne.s32.totalorder %s2289_s25, 0 }
  0x88   : > { %p1700_p0 = scmp.ne.s32.totalorder %s2224_s28, %s1699_s15  ;;  %s1801_s22 = smov [#allocation8]  }
  0x89   : > { %s1703_s11 = sshll.u32 %s1801_s22, 4  ;;  %s1704_s11 = int_to_ptr.vmem [resolvable:$false] %s1703_s11 }
  0x8a   : > { %1413 = vmatmul.mubr.msk.bf16.vlgmr.msra.gmra.mrb[4].mxu0 %vm308_vm1, %v286_v13  ;;  %1419 = vmatmul.mubr.msk.bf16.vlgmr.msra.gmra.mrb[4].mxu1 %vm308_vm1, %v287_v14  ;;  %v2156_v13 = vsel %vm761_vm3, %v305_v11, 0  ;;  %v306_v14 = vld [vmem:[%s250_s18 + $0x18] sm:$0xf]  ;;  %p1701_p8 = pnand %p1700_p0, %p2303_p10  ;;  %s1705_s19 = scalar_lea.vmem %s1704_s11, 128 }
  0x8b   : > { %1423 = vmatpush3.bf16.xpose.msra.mxu0 %v497_v15  ;;  %1429 = vmatpush3.bf16.xpose.msra.mxu1 %v543_v16  ;;  %v307_v15 = vld [vmem:[%s250_s18 + $0x1c] sm:$0xf]  ;;  %v2159_v16 = vsel %vm761_vm3, %v306_v14, 0  ;;  %p1706_p12 = scmp.lt.s32.totalorder %s2224_s28, %s1704_s11  ;;  %p1707_p1 = scmp.lt.s32.totalorder %s1705_s19, %s1699_s15 }
  0x8c   : > { %1424 = vmatprep.mubr.msk.bf16.mxu0 %vm1793_vm0, %v1792_v0  ;;  %1430 = vmatprep.mubr.msk.bf16.mxu1 %vm1793_vm0, %v1792_v0  ;;  %v2162_v17 = vsel %vm761_vm3, %v307_v15, 0  ;;  %p1702_p9 = pneg %p1701_p8 }
  0x8d   : > { %1434 = vmatprep.subr.bf16.mxu0 %v1792_v0  ;;  %1440 = vmatprep.subr.bf16.mxu1 %v1792_v0  ;;  %p1708_p6 = por %p1707_p1, %p1706_p12 }
  0x8f   : > { %p1709_p13 = pnand %p1708_p6, %p1702_p9 }
  0x92   : > { %1425 = vmatmul.mubr.msk.bf16.vlgmr.msra.gmra.mrb[8].mxu0 %vm308_vm1, %v288_v19  ;;  %1431 = vmatmul.mubr.msk.bf16.vlgmr.msra.gmra.mrb[8].mxu1 %vm308_vm1, %v289_v20 }
  0x93   : > { %1435 = vmatpush3.bf16.xpose.msra.mxu0 %v589_v21  ;;  %1441 = vmatpush3.bf16.xpose.msra.mxu1 %v635_v22 }
  0x94   : > { %1436 = vmatprep.mubr.msk.bf16.mxu0 %vm1793_vm0, %v1792_v0  ;;  %1442 = vmatprep.mubr.msk.bf16.mxu1 %vm1793_vm0, %v1792_v0 }
  0x95   : > { %1446 = vmatprep.subr.bf16.mxu0 %v1792_v0  ;;  %1452 = vmatprep.subr.bf16.mxu1 %v1792_v0 }
  0x9a   : > { %1437 = vmatmul.mubr.msk.bf16.vlgmr.msra.gmra.mrb[12].mxu0 %vm308_vm1, %v290_v23  ;;  %1443 = vmatmul.mubr.msk.bf16.vlgmr.msra.gmra.mrb[12].mxu1 %vm308_vm1, %v291_v24 }
  0x9b   : > { %1448 = vmatprep.mubr.msk.bf16.mxu0 %vm1793_vm0, %v1792_v0  ;;  %1454 = vmatprep.mubr.msk.bf16.mxu1 %vm1793_vm0, %v1792_v0 }
  0x9c   : > { %1447 = vmatpush3.bf16.msra.mxu0 %v763_v3  ;;  %1453 = vmatpush3.bf16.msra.mxu1 %v809_v5 }
  0x9d   : > { %1458 = vmatprep.subr.bf16.mxu0 %v1792_v0  ;;  %1464 = vmatprep.subr.bf16.mxu1 %v1792_v0 }
 0x155   : > { %v2115_v25 = vpop.f32.mrb[0].mxu0  ;;  %v2117_v26 = vpop.f32.mrb[0].mxu1 }
 0x156   : > { %v1402_v27 = vpop.f32.mrb[1].mxu0  ;;  %v678_v28 = vsel %vm677_vm2, %v2115_v25, -inf  ;;  %v1408_v29 = vpop.f32.mrb[1].mxu1  ;;  %v681_v34 = vsel %vm677_vm2, %v2117_v26, -inf }
 0x157   : > { %679 = vmax.xlane.f32.xlu0 %v678_v28  ;;  %v352_v30 = vpop.f32.mrb[2].mxu0  ;;  %v398_v31 = vpop.f32.mrb[2].mxu1 }
 0x158   : > { %v1403_v32 = vpop.f32.mrb[3].mxu0  ;;  %v1409_v33 = vpop.f32.mrb[3].mxu1 }
 0x15b   : > { %682 = vmax.xlane.f32.xlu0 %v681_v34 }
 0x15d   : > { %v2123_v35 = vpop.f32.mrb[4].mxu0  ;;  %v2125_v36 = vpop.f32.mrb[4].mxu1 }
 0x15e   : > { %v1414_v37 = vpop.f32.mrb[5].mxu0  ;;  %v684_v38 = vsel %vm677_vm2, %v2123_v35, -inf  ;;  %v1420_v39 = vpop.f32.mrb[5].mxu1  ;;  %v687_v44 = vsel %vm677_vm2, %v2125_v36, -inf }
 0x15f   : > { %685 = vmax.xlane.f32.xlu1 %v684_v38  ;;  %v444_v40 = vpop.f32.mrb[6].mxu0  ;;  %v490_v41 = vpop.f32.mrb[6].mxu1 }
 0x160   : > { %v1415_v42 = vpop.f32.mrb[7].mxu0  ;;  %v1421_v43 = vpop.f32.mrb[7].mxu1 }
 0x163   : > { %688 = vmax.xlane.f32.xlu1 %v687_v44 }
 0x165   : > { %v2131_v45 = vpop.f32.mrb[8].mxu0  ;;  %v2133_v46 = vpop.f32.mrb[8].mxu1 }
 0x166   : > { %v693_v47 = vsel %vm677_vm2, %v2133_v46, -inf  ;;  %v690_v48 = vsel %vm677_vm2, %v2131_v45, -inf  ;;  %v1426_v49 = vpop.f32.mrb[9].mxu0  ;;  %v1432_v50 = vpop.f32.mrb[9].mxu1 }
 0x167   : > { %694 = vmax.xlane.f32.xlu1 %v693_v47  ;;  %691 = vmax.xlane.f32.xlu0 %v690_v48  ;;  %v536_v51 = vpop.f32.mrb[10].mxu0  ;;  %v582_v52 = vpop.f32.mrb[10].mxu1 }
 0x168   : > { %v1427_v53 = vpop.f32.mrb[11].mxu0  ;;  %v1433_v54 = vpop.f32.mrb[11].mxu1 }
 0x16d   : > { %v2139_v55 = vpop.f32.mrb[12].mxu0  ;;  %v2141_v56 = vpop.f32.mrb[12].mxu1 }
 0x16e   : > { %v699_v57 = vsel %vm677_vm2, %v2141_v56, -inf  ;;  %v696_v58 = vsel %vm677_vm2, %v2139_v55, -inf  ;;  %v1438_v59 = vpop.f32.mrb[13].mxu0  ;;  %v1444_v60 = vpop.f32.mrb[13].mxu1 }
 0x16f   : > { %700 = vmax.xlane.f32.xlu1 %v699_v57  ;;  %697 = vmax.xlane.f32.xlu0 %v696_v58  ;;  %v628_v61 = vpop.f32.mrb[14].mxu0  ;;  %v674_v62 = vpop.f32.mrb[14].mxu1 }
 0x170   : > { %v1439_v63 = vpop.f32.mrb[15].mxu0  ;;  %v1445_v1 = vpop.f32.mrb[15].mxu1 }
 0x1e4   : > { %v680_v18 = vpop.xlane.xlu0 %679 }
 0x1e5   : > { %v702_v19 = vsub.f32 %v2115_v25, %v680_v18 }
 0x1e7   : > { %v710_v20 = vmul.f32 1.442695, %v702_v19 }
 0x1e8   : > { %v683_v21 = vpop.xlane.xlu0 %682 }
 0x1e9   : > { %1577 = vpow2.f32 %v710_v20  ;;  %v703_v22 = vsub.f32 %v2117_v26, %v683_v21 }
 0x1eb   : > { %v712_v23 = vmul.f32 1.442695, %v703_v22 }
 0x1ec   : > { %v686_v24 = vpop.xlane.xlu1 %685 }
 0x1ed   : > { %1579 = vpow2.f32 %v712_v23  ;;  %v704_v27 = vsub.f32 %v2123_v35, %v686_v24 }
 0x1ef   : > { %v714_v28 = vmul.f32 1.442695, %v704_v27 }
 0x1f0   : > { %v689_v29 = vpop.xlane.xlu1 %688 }
 0x1f1   : > { %1581 = vpow2.f32 %v714_v28  ;;  %v705_v30 = vsub.f32 %v2125_v36, %v689_v29 }
 0x1f3   : > { %v2168_v31 = vpop.eup %1577  ;;  %v716_v32 = vmul.f32 1.442695, %v705_v30 }
 0x1f4   : > { %v695_v33 = vpop.xlane.xlu1 %694  ;;  %v692_v25 = vpop.xlane.xlu0 %691  ;;  %v750_v34 = vpack.c.bf16 %v2168_v31, %v2168_v31  ;;  %v726_v2 = vsel %vm677_vm2, %v2168_v31, 0.0 }
 0x1f5   : > { %1583 = vpow2.f32 %v716_v32  ;;  %v707_v26 = vsub.f32 %v2133_v46, %v695_v33  ;;  %v706_v37 = vsub.f32 %v2131_v45, %v692_v25 }
 0x1f6   : > { %1449 = vmatmul.mubr.msk.bf16.vlgmr.msra.gmra.mrb[16].mxu0 %vm677_vm2, %v750_v34 }
 0x1f7   : > { %v1580_v35 = vpop.eup %1579  ;;  %v720_v38 = vmul.f32 1.442695, %v707_v26  ;;  %v718_v39 = vmul.f32 1.442695, %v706_v37  ;;  %1459 = vmatpush3.bf16.msra.mxu0 %v855_v8  ;;  %1460 = vmatprep.mubr.msk.bf16.mxu0 %vm1793_vm0, %v1792_v0 }
 0x1f8   : > { %v729_v36 = vsel %vm677_vm2, %v1580_v35, 0.0  ;;  %v751_v40 = vpack.c.bf16 %v1580_v35, %v1580_v35  ;;  %1470 = vmatprep.subr.bf16.mxu0 %v1792_v0 }
 0x1f9   : > { %1585 = vpow2.f32 %v720_v38  ;;  %730 = vadd.xlane.f32.xlu0 %v729_v36 }
 0x1fa   : > { %1587 = vpow2.f32 %v718_v39  ;;  %1455 = vmatmul.mubr.msk.bf16.vlgmr.msra.gmra.mrb[16].mxu1 %vm677_vm2, %v751_v40 }
 0x1fb   : > { %v1582_v41 = vpop.eup %1581  ;;  %1465 = vmatpush3.bf16.msra.mxu1 %v901_v9  ;;  %1466 = vmatprep.mubr.msk.bf16.mxu1 %vm1793_vm0, %v1792_v0 }
 0x1fc   : > { %v701_v42 = vpop.xlane.xlu1 %700  ;;  %v698_v43 = vpop.xlane.xlu0 %697  ;;  %v732_v44 = vsel %vm677_vm2, %v1582_v41, 0.0  ;;  %v752_v45 = vpack.c.bf16 %v1582_v41, %v1582_v41  ;;  %1476 = vmatprep.subr.bf16.mxu1 %v1792_v0 }
 0x1fd   : > { %v709_v46 = vsub.f32 %v2141_v56, %v701_v42  ;;  %v708_v47 = vsub.f32 %v2139_v55, %v698_v43  ;;  %733 = vadd.xlane.f32.xlu1 %v732_v44 }
 0x1fe   : > { %1461 = vmatmul.mubr.msk.bf16.vlgmr.msra.gmra.mrb[20].mxu0 %vm677_vm2, %v752_v45 }
 0x1ff   : > { %v1584_v48 = vpop.eup %1583  ;;  %v724_v49 = vmul.f32 1.442695, %v709_v46  ;;  %v722_v50 = vmul.f32 1.442695, %v708_v47  ;;  %1471 = vmatpush3.bf16.msra.mxu0 %v947_v12  ;;  %1472 = vmatprep.mubr.msk.bf16.mxu0 %vm1793_vm0, %v1792_v0 }
 0x200   : > { %v735_v51 = vsel %vm677_vm2, %v1584_v48, 0.0  ;;  %v753_v52 = vpack.c.bf16 %v1584_v48, %v1584_v48  ;;  %1482 = vmatprep.subr.bf16.mxu0 %v1792_v0 }
 0x201   : > { %1589 = vpow2.f32 %v724_v49  ;;  %736 = vadd.xlane.f32.xlu0 %v735_v51 }
 0x202   : > { %1591 = vpow2.f32 %v722_v50  ;;  %1467 = vmatmul.mubr.msk.bf16.vlgmr.msra.gmra.mrb[20].mxu1 %vm677_vm2, %v753_v52 }
 0x203   : > { %v1586_v53 = vpop.eup %1585  ;;  %1477 = vmatpush3.bf16.msra.mxu1 %v2156_v13  ;;  %1478 = vmatprep.mubr.msk.bf16.mxu1 %vm1793_vm0, %v1792_v0 }
 0x204   : > { %v1588_v54 = vpop.eup %1587  ;;  %v741_v55 = vsel %vm677_vm2, %v1586_v53, 0.0  ;;  %1488 = vmatprep.subr.bf16.mxu1 %v1792_v0  ;;  %v755_v58 = vpack.c.bf16 %v1586_v53, %v1586_v53 }
 0x205   : > { %v738_v56 = vsel %vm677_vm2, %v1588_v54, 0.0  ;;  %742 = vadd.xlane.f32.xlu0 %v741_v55  ;;  %v754_v57 = vpack.c.bf16 %v1588_v54, %v1588_v54 }
 0x206   : > { %739 = vadd.xlane.f32.xlu1 %v738_v56 }
 0x207   : > { %1473 = vmatmul.mubr.msk.bf16.vlgmr.msra.gmra.mrb[24].mxu0 %vm677_vm2, %v754_v57 }
 0x208   : > { %1483 = vmatpush3.bf16.msra.mxu0 %v2159_v16  ;;  %1484 = vmatprep.mubr.msk.bf16.mxu0 %vm1793_vm0, %v1792_v0 }
 0x20a   : > { %1479 = vmatmul.mubr.msk.bf16.vlgmr.msra.gmra.mrb[24].mxu1 %vm677_vm2, %v755_v58 }
 0x20b   : > { %v1590_v59 = vpop.eup %1589  ;;  %1489 = vmatpush3.bf16.msra.mxu1 %v2162_v17  ;;  %1490 = vmatprep.mubr.msk.bf16.mxu1 %vm1793_vm0, %v1792_v0 }
 0x20c   : > { %v1592_v60 = vpop.eup %1591  ;;  %v747_v61 = vsel %vm677_vm2, %v1590_v59, 0.0  ;;  %v757_v1 = vpack.c.bf16 %v1590_v59, %v1590_v59 }
 0x20d   : > { %748 = vadd.xlane.f32.xlu0 %v747_v61  ;;  %v744_v62 = vsel %vm677_vm2, %v1592_v60, 0.0  ;;  %v756_v63 = vpack.c.bf16 %v1592_v60, %v1592_v60 }
 0x20e   : > { %745 = vadd.xlane.f32.xlu1 %v744_v62 }
 0x20f   : > { %1485 = vmatmul.mubr.msk.bf16.vlgmr.msra.gmra.mrb[28].mxu0 %vm677_vm2, %v756_v63 }
 0x212   : > { %727 = vadd.xlane.f32.xlu1 %v726_v2  ;;  %1491 = vmatmul.mubr.msk.bf16.vlgmr.msra.gmra.mrb[28].mxu1 %vm677_vm2, %v757_v1 }
 0x286   : > { %v731_v3 = vpop.xlane.xlu0 %730 }
 0x287   : > { %1593 = vrcp.f32 %v731_v3 }
 0x28a   : > { %v734_v0 = vpop.xlane.xlu1 %733 }
 0x28b   : > { %1595 = vrcp.f32 %v734_v0 }
 0x28e   : > { %v737_v4 = vpop.xlane.xlu0 %736 }
 0x28f   : > { %1597 = vrcp.f32 %v737_v4 }
 0x291   : > { %v1594_v9 = vpop.eup %1593 }
 0x292   : > { %v743_v15 = vpop.xlane.xlu0 %742 }
 0x293   : > { %v740_v10 = vpop.xlane.xlu1 %739 }
 0x294   : > { %1599 = vrcp.f32 %v740_v10 }
 0x295   : > { %v1596_v17 = vpop.eup %1595  ;;  %1601 = vrcp.f32 %v743_v15 }
 0x299   : > { %v1598_v23 = vpop.eup %1597 }
 0x29a   : > { %v749_v31 = vpop.xlane.xlu0 %748 }
 0x29b   : > { %v746_v24 = vpop.xlane.xlu1 %745 }
 0x29c   : > { %1603 = vrcp.f32 %v746_v24 }
 0x29d   : > { %1605 = vrcp.f32 %v749_v31 }
 0x29e   : > { %v1600_v33 = vpop.eup %1599 }
 0x29f   : > { %v1602_v35 = vpop.eup %1601  ;;  %v728_v55 = vpop.xlane.xlu1 %727 }
 0x2a0   : > { %1607 = vrcp.f32 %v728_v55 }
 0x2a6   : > { %v1604_v43 = vpop.eup %1603 }
 0x2a7   : > { %v1606_v48 = vpop.eup %1605 }
 0x2aa   : > { %v1608_v58 = vpop.eup %1607 }
 0x2c9   : > { %v2212_v5 = vpop.f32.mrb[16].mxu0 }
 0x2ca   : > { %v1450_v6 = vpop.f32.mrb[17].mxu0  ;;  %v1135_v60 = vmul.f32 %v1608_v58, %v2212_v5 }
 0x2cb   : > { %v802_v7 = vpop.f32.mrb[18].mxu0 }
 0x2cc   : > { %v1451_v8 = vpop.f32.mrb[19].mxu0 }
 0x2cd   : > { %v845_v11 = vpop.f32.mrb[16].mxu1 }
 0x2ce   : > { %v1136_v12 = vmul.f32 %v1594_v9, %v845_v11  ;;  %v1456_v13 = vpop.f32.mrb[17].mxu1 }
 0x2cf   : > { %v848_v14 = vpop.f32.mrb[18].mxu1 }
 0x2d0   : > { %v1457_v16 = vpop.f32.mrb[19].mxu1  ;;  %1144 = vrot.lane.b32.xlu0 %v1136_v12, %s1794_s24 }
 0x2d1   : > { %v891_v18 = vpop.f32.mrb[20].mxu0 }
 0x2d2   : > { %v1137_v19 = vmul.f32 %v1596_v17, %v891_v18  ;;  %v1462_v20 = vpop.f32.mrb[21].mxu0 }
 0x2d3   : > { %v894_v21 = vpop.f32.mrb[22].mxu0 }
 0x2d4   : > { %1148 = vrot.lane.b32.xlu1 %v1137_v19, %s1795_s16  ;;  %v1463_v22 = vpop.f32.mrb[23].mxu0 }
 0x2d5   : > { %v937_v27 = vpop.f32.mrb[20].mxu1 }
 0x2d6   : > { %v1138_v28 = vmul.f32 %v1598_v23, %v937_v27  ;;  %v1468_v29 = vpop.f32.mrb[21].mxu1 }
 0x2d7   : > { %v940_v30 = vpop.f32.mrb[22].mxu1 }
 0x2d8   : > { %v1469_v32 = vpop.f32.mrb[23].mxu1  ;;  %1152 = vrot.lane.b32.xlu1 %v1138_v28, %s1796_s20 }
 0x2da   : > { %v983_v25 = vpop.f32.mrb[24].mxu0 }
 0x2db   : > { %v1139_v34 = vmul.f32 %v1600_v33, %v983_v25  ;;  %v1474_v26 = vpop.f32.mrb[25].mxu0 }
 0x2dc   : > { %v986_v37 = vpop.f32.mrb[26].mxu0 }
 0x2dd   : > { %1156 = vrot.lane.b32.xlu1 %v1139_v34, %s1797_s5  ;;  %v1475_v38 = vpop.f32.mrb[27].mxu0  ;;  %v1029_v39 = vpop.f32.mrb[24].mxu1 }
 0x2de   : > { %v1140_v36 = vmul.f32 %v1602_v35, %v1029_v39  ;;  %v1480_v40 = vpop.f32.mrb[25].mxu1 }
 0x2df   : > { %v1032_v41 = vpop.f32.mrb[26].mxu1 }
 0x2e0   : > { %v1481_v42 = vpop.f32.mrb[27].mxu1  ;;  %1160 = vrot.lane.b32.xlu0 %v1140_v36, %s1798_s7 }
 0x2e2   : > { %v1075_v44 = vpop.f32.mrb[28].mxu0 }
 0x2e3   : > { %v1141_v45 = vmul.f32 %v1604_v43, %v1075_v44  ;;  %v1486_v46 = vpop.f32.mrb[29].mxu0 }
 0x2e4   : > { %v1078_v47 = vpop.f32.mrb[30].mxu0 }
 0x2e5   : > { %1164 = vrot.lane.b32.xlu1 %v1141_v45, %s1799_s30  ;;  %v1487_v49 = vpop.f32.mrb[31].mxu0  ;;  %v1121_v50 = vpop.f32.mrb[28].mxu1 }
 0x2e6   : > { %v1142_v51 = vmul.f32 %v1606_v48, %v1121_v50  ;;  %v1492_v52 = vpop.f32.mrb[29].mxu1 }
 0x2e7   : > { %v1124_v53 = vpop.f32.mrb[30].mxu1 }
 0x2e8   : > { %v1493_v54 = vpop.f32.mrb[31].mxu1  ;;  %1168 = vrot.lane.b32.xlu0 %v1142_v51, %s1800_s6 }
 0x342   : > { %v1145_v59 = vpop.permute.xlu0 %1144 }
 0x343   : > { %v1171_v62 = vsel %vm308_vm1, %v1135_v60, %v1145_v59 }
 0x346   : > { %v1149_v56 = vpop.permute.xlu1 %1148 }
 0x347   : > { %v1172_v63 = vsel %vm677_vm2, %v1171_v62, %v1149_v56 }
 0x34a   : > { %v1153_v57 = vpop.permute.xlu1 %1152 }
 0x34b   : > { %v1174_v2 = vsel %vm1173_vm4, %v1172_v63, %v1153_v57 }
 0x34f   : > { %v1157_v61 = vpop.permute.xlu1 %1156 }
 0x350   : > { %v1176_v0 = vsel %vm1175_vm5, %v1174_v2, %v1157_v61 }
 0x352   : > { %v1161_v1 = vpop.permute.xlu0 %1160 }
 0x353   : > { %v1178_v4 = vsel %vm1177_vm6, %v1176_v0, %v1161_v1 }
 0x357   : > { %v1165_v3 = vpop.permute.xlu1 %1164 }
 0x358   : > { %v1180_v5 = vsel %vm1179_vm7, %v1178_v4, %v1165_v3 }
 0x35a   : > { %v1169_v6 = vpop.permute.xlu0 %1168 }
 0x35b   : > { %v1182_v7 = vsel %vm1181_vm8, %v1180_v5, %v1169_v6 }
 0x35c   : > { %v1183_v8 = vpack.c.bf16 %v1182_v7, %v1182_v7 }
 0x35e   : > { %1185 = vst.msk [vmem:[%s282_s1] sm:$0xf] %vm1184_vm9, %v1183_v8 }
 0x35f   : > { %1712 = shalt.err (!%p1709_p13)
}
 0x360   : > { %s1713_s21 = scalar_lea.hbm %s2222_s10, 64  ;;  %s1717_s24 = scalar_lea.hbm %s2274_s3, 128 }
 0x361   : > { %p1714_p11 = scmp.ne.s32.totalorder %s2222_s10, %s1713_s21  ;;  %p1718_p7 = scmp.lt.u32.totalorder %s2222_s10, %s2274_s3 }
 0x362   : > { %p1719_p4 = scmp.lt.u32.totalorder %s1717_s24, %s1713_s21  ;;  %p1721_p0 = scmp.lt.u32.totalorder %s1713_s21, %s2222_s10 }
 0x363   : > { %p1715_p2 = pnand %p1714_p11, %p2303_p10 }
 0x364   : > { %p1720_p3 = por %p1719_p4, %p1718_p7 }
 0x365   : > { %p1716_p5 = pneg %p1715_p2 }
 0x366   : > { %p1722_p8 = por %p1721_p0, %p1720_p3 }
 0x368   : > { %p1723_p9 = pnand %p1722_p8, %p1716_p5 }
 0x36a   : > { %1726 = shalt.err (!%p1723_p9)
}
 0x36b   : > { %1500 = dma.vmem_to_hbm [thread:$0]  (%p2303_p10), %s2224_s28, 64, %s2222_s10, %s1187_s4  }
 0x36c PF: > { %s1213_s5 = sand.u32 1, %s1765_s12   ;;  %p2304_p12 = scmp.ne.s32.totalorder %s2291_s27, 0 }
 0x36d   : > { %p2305_p1 = scmp.ge.s32.totalorder %s1785_s17, 2  ;;  %s1214_s7 = scalar_lea.sflag [#allocation4], %s1213_s5 }
 0x36f   : > { %p1513_p6 = pnand %p2305_p1, %p2304_p12 }
 0x371   : > { %1760 = dma.done.wait (!%p1513_p6), %s1214_s7, 64  }
 0x372   : > { %1762 = vsyncadd (!%p1513_p6), %s1214_s7, 4294967232  ;;  %s22_s17 = sadd.s32 1, %s1785_s17   ;;  %s2306_s25 = sld [smem:[#allocation14_spill]] }
 0x373   : > { %p19_p13 = scmp.ge.s32.totalorder %s22_s17, 4   ;;  %s2307_s15 = sld [smem:[#allocation12_spill]] }
 0x374   : > { %s2308_s16 = sld [smem:[#allocation13_spill]]  ;;  %s2309_s12 = smov %s1769_s13 }
 0x375   : > { %s2310_s13 = smov %s1773_s14  ;;  %21 = sbr.rel (!%p19_p13) target bundleno = 10 (0xa), region = 101 }
 0x378   : > { %s2311_s14 = smov %s2306_s25 }
 0x37c   :  { %1219 = vsyncpa [#allocation3], 1 }
 0x37d   :  { %1221 = vsyncpa [#allocation3 + $0x1], 1 }
 0x37e   :  { %1222 = vsyncpa [#allocation6], 1 }
 0x37f   :  { %1224 = vsyncpa [#allocation6 + $0x1], 1 }
 0x380   :  { %1225 = vsyncpa [#allocation4], 1 }
 0x381   :  { %1227 = vsyncpa [#allocation4 + $0x1], 1 }

</bundles_post_ra>
